<compile_context>
chip_gen: v6e
topology: v6e:2x2x1
jax: 0.10.0
libtpu: 0.0.40
codegen_flags: <defaults>
</compile_context>

<pallas_src>
import functools

import jax
import jax.numpy as jnp
import numpy as np
from jax.experimental import pallas as pl
from jax.experimental.pallas import tpu as pltpu


def _cross_attn_kernel(x_ref, kv_ref, lnw_ref, wq_ref, wk_ref, wv_ref, wo_ref,
                       out_ref, o_scratch,
                       *, n_heads, d_kv, eps, compute_dtype, approx_recip):
    # x_ref:        (TQ, D)        f32            query-side hidden (residual source)
    # kv_ref:       (Lk, D)        compute_dtype  encoder hidden states
    # lnw_ref:      (1, D)         f32
    # wq/wk/wv_ref: (H, D, d_kv)   compute_dtype  head-major weights
    # wo_ref:       (H*d_kv, D)    compute_dtype
    # o_scratch:    (TQ, H*d_kv)   compute_dtype  per-head context buffer
    x = x_ref[...]
    kv = kv_ref[...]

    # ---- T5LayerNorm (RMS norm), statistics in f32 ----
    var = jnp.mean(x * x, axis=-1, keepdims=True)
    normed = (x * jax.lax.rsqrt(var + eps) * lnw_ref[...]).astype(compute_dtype)

    # ---- per-head attention (no scaling, no mask, zero position bias) ----
    for h in range(n_heads):
        lo = h * d_kv
        qh = jnp.dot(normed, wq_ref[h],
                     preferred_element_type=jnp.float32).astype(compute_dtype)   # (TQ, dk)
        kh = jnp.dot(kv, wk_ref[h],
                     preferred_element_type=jnp.float32).astype(compute_dtype)   # (Lk, dk)
        vh = jnp.dot(kv, wv_ref[h],
                     preferred_element_type=jnp.float32).astype(compute_dtype)   # (Lk, dk)

        # scores: contract over d_kv of BOTH operands -> no explicit transpose.
        s = jax.lax.dot_general(qh, kh,
                                dimension_numbers=(((1,), (1,)), ((), ())),
                                preferred_element_type=jnp.float32)              # (TQ, Lk)
        # softmax in f32
        s = s - jnp.max(s, axis=-1, keepdims=True)
        p = jnp.exp(s)
        p = p * pl.reciprocal(jnp.sum(p, axis=-1, keepdims=True),
                              approx=approx_recip)
        oh = jnp.dot(p.astype(compute_dtype), vh,
                     preferred_element_type=jnp.float32)                         # (TQ, dk)
        o_scratch[:, lo:lo + d_kv] = oh.astype(compute_dtype)

    # ---- single K = H*d_kv output projection + residual ----
    proj = jnp.dot(o_scratch[...], wo_ref[...],
                   preferred_element_type=jnp.float32)                           # (TQ, D)
    out_ref[...] = (x + proj).astype(out_ref.dtype)


def _build_call(kernel, *, B, Lq, Lk, D, n_heads, d_kv, tq, out_dtype,
                compute_dtype, buffered_weights):
    inner = n_heads * d_kv

    def const_spec(shape):
        imap = lambda b, i, _n=len(shape): (0,) * _n
        if buffered_weights:
            # Constant block index -> single-buffer (saves VMEM, matters on v7x).
            return pl.BlockSpec(shape, imap, pipeline_mode=pl.Buffered(1))
        return pl.BlockSpec(shape, imap)

    return pl.pallas_call(
        kernel,
        out_shape=jax.ShapeDtypeStruct((B, Lq, D), out_dtype),
        grid_spec=pltpu.PrefetchScalarGridSpec(
            num_scalar_prefetch=0,
            grid=(B, Lq // tq),
            in_specs=[
                pl.BlockSpec((None, tq, D), lambda b, i: (b, i, 0)),   # hidden (Q side)
                pl.BlockSpec((None, Lk, D), lambda b, i: (b, 0, 0)),   # key/value states
                const_spec((1, D)),                                    # layer-norm weight
                const_spec((n_heads, D, d_kv)),                        # Wq (head-major)
                const_spec((n_heads, D, d_kv)),                        # Wk
                const_spec((n_heads, D, d_kv)),                        # Wv
                const_spec((inner, D)),                                # Wo
            ],
            out_specs=pl.BlockSpec((None, tq, D), lambda b, i: (b, i, 0)),
            scratch_shapes=[pltpu.VMEM((tq, inner), compute_dtype)],
        ),
        compiler_params=pltpu.CompilerParams(
            dimension_semantics=("parallel", "parallel"),
            vmem_limit_bytes=48 * 1024 * 1024,   # below v7x's 64 MiB physical VMEM
        ),
    )


def t5_layer_cross_attention(hidden, kv, ln_w, wq, wk, wv, wo, *, n_heads, d_kv,
                             eps=1e-6, compute_dtype=jnp.float32, q_block=256):
    """T5LayerCrossAttention forward.

    hidden: (B, Lq, D), kv: (B, Lk, D); wq/wk/wv: (D, H*d_kv), wo: (H*d_kv, D)
    (already transposed for `x @ W`).  `compute_dtype` is the MXU operand dtype
    (bf16 recommended); norm/softmax statistics and the residual stay in f32.
    """
    B, Lq, D = hidden.shape
    _, Lk, _ = kv.shape
    compute_dtype = jnp.dtype(compute_dtype)

    # Head-major weights (H, D, d_kv): in-kernel head selection becomes a cheap
    # leading-dim index instead of a sub-128 lane slice.
    def headify(w):
        return jnp.transpose(w.reshape(D, n_heads, d_kv), (1, 0, 2)).astype(compute_dtype)

    wq_h, wk_h, wv_h = headify(wq), headify(wk), headify(wv)
    wo_c = wo.astype(compute_dtype)
    ln_w2 = ln_w.reshape(1, D).astype(jnp.float32)
    hidden_f = hidden.astype(jnp.float32)   # f32 needed for RMS norm + residual
    kv_c = kv.astype(compute_dtype)         # only feeds K/V matmuls -> halves DMA in bf16

    # Q-length tiling: bounds the (TQ, Lk) score matrix and gives the pipeliner
    # enough grid steps to overlap DMA with compute / shard across TCs.
    tq = min(q_block, Lq)
    if Lq % tq != 0:
        tq = Lq

    kernel = functools.partial(
        _cross_attn_kernel, n_heads=n_heads, d_kv=d_kv, eps=eps,
        compute_dtype=compute_dtype,
        approx_recip=(compute_dtype != jnp.dtype(jnp.float32)))

    args = (hidden_f, kv_c, ln_w2, wq_h, wk_h, wv_h, wo_c)
    common = dict(B=B, Lq=Lq, Lk=Lk, D=D, n_heads=n_heads, d_kv=d_kv, tq=tq,
                  out_dtype=hidden.dtype, compute_dtype=compute_dtype)
    try:
        return _build_call(kernel, buffered_weights=True, **common)(*args)
    except Exception:
        # Fallback if this JAX build rejects pl.Buffered(1) on the main pipeline.
        return _build_call(kernel, buffered_weights=False, **common)(*args)


def _reference(hidden, kv, ln_w, wq, wk, wv, wo, n_heads, d_kv, eps=1e-6):
    """Pure-JAX reference of the same forward pass."""
    B, Lq, D = hidden.shape
    var = jnp.mean(hidden * hidden, axis=-1, keepdims=True)
    normed = hidden * jax.lax.rsqrt(var + eps) * ln_w
    q = normed @ wq
    k = kv @ wk
    v = kv @ wv

    def split(x):
        return x.reshape(x.shape[0], x.shape[1], n_heads, d_kv).transpose(0, 2, 1, 3)

    qh, kh, vh = split(q), split(k), split(v)
    s = jnp.einsum("bhqd,bhkd->bhqk", qh, kh)
    p = jax.nn.softmax(s, axis=-1)
    o = jnp.einsum("bhqk,bhkd->bhqd", p, vh)
    o = o.transpose(0, 2, 1, 3).reshape(B, Lq, n_heads * d_kv)
    return hidden + o @ wo


if __name__ == "__main__":
    # Small T5-like config: d_model=32, n_heads=4, d_kv=8 (inner=32)
    B, Lq, Lk, D = 2, 8, 16, 32
    n_heads, d_kv = 4, 8
    inner = n_heads * d_kv

    key = jax.random.PRNGKey(0)
    k0, k1, k2, k3, k4, k5, k6 = jax.random.split(key, 7)
    hidden = jax.random.normal(k0, (B, Lq, D), dtype=jnp.float32)
    kv_states = jax.random.normal(k1, (B, Lk, D), dtype=jnp.float32)
    # T5 linears have no bias; layernorm weight ~ ones.
    wq = jax.random.normal(k2, (D, inner), dtype=jnp.float32) * 0.05
    wk = jax.random.normal(k3, (D, inner), dtype=jnp.float32) * 0.05
    wv = jax.random.normal(k4, (D, inner), dtype=jnp.float32) * 0.05
    wo = jax.random.normal(k5, (inner, D), dtype=jnp.float32) * 0.05
    ln_w = jnp.ones((D,), dtype=jnp.float32) + 0.01 * jax.random.normal(k6, (D,))

    ref = _reference(hidden, kv_states, ln_w, wq, wk, wv, wo, n_heads, d_kv)

    # Exact f32 path -> tight tolerance against the JAX reference.
    out_f32 = t5_layer_cross_attention(hidden, kv_states, ln_w, wq, wk, wv, wo,
                                       n_heads=n_heads, d_kv=d_kv,
                                       compute_dtype=jnp.float32)
    out_f32 = jax.block_until_ready(out_f32)
    np.testing.assert_allclose(np.asarray(out_f32), np.asarray(ref),
                               rtol=1e-5, atol=1e-5)

    # bf16 MXU-operand path (production config) -> looser tolerance.
    out_bf16 = t5_layer_cross_attention(hidden, kv_states, ln_w, wq, wk, wv, wo,
                                        n_heads=n_heads, d_kv=d_kv,
                                        compute_dtype=jnp.bfloat16)
    out_bf16 = jax.block_until_ready(out_bf16)
    np.testing.assert_allclose(np.asarray(out_bf16), np.asarray(ref),
                               rtol=2e-2, atol=2e-2)

    print("KERNEL_OK")
</pallas_src>

<mosaic_0001>
module attributes {stable_mosaic.version = 11 : i64} {
  func.func @_cross_attn_kernel(%arg0: i32, %arg1: i32, %arg2: memref<1x8x32xf32, #tpu.memory_space<vmem>>, %arg3: memref<1x16x32xf32, #tpu.memory_space<vmem>>, %arg4: memref<1x32xf32, #tpu.memory_space<vmem>>, %arg5: memref<4x32x8xf32, #tpu.memory_space<vmem>>, %arg6: memref<4x32x8xf32, #tpu.memory_space<vmem>>, %arg7: memref<4x32x8xf32, #tpu.memory_space<vmem>>, %arg8: memref<32x32xf32, #tpu.memory_space<vmem>>, %arg9: memref<1x8x32xf32, #tpu.memory_space<vmem>>, %arg10: memref<8x32xf32, #tpu.memory_space<vmem>>) attributes {dimension_semantics = [#tpu.dimension_semantics<parallel>, #tpu.dimension_semantics<parallel>], iteration_bounds = array<i64: 2, 1>, scalar_prefetch = 0 : i64, scratch_operands = 1 : i64, tpu.core_type = #tpu.core_type<tc>, window_params = [{transform_indices = @transform_0, window_bounds = array<i64: 1, 8, 32>}, {transform_indices = @transform_1, window_bounds = array<i64: 1, 16, 32>}, {pipeline_mode = #tpu.pipeline_mode<synchronous>, transform_indices = @transform_2, window_bounds = array<i64: 1, 32>}, {pipeline_mode = #tpu.pipeline_mode<synchronous>, transform_indices = @transform_3, window_bounds = array<i64: 4, 32, 8>}, {pipeline_mode = #tpu.pipeline_mode<synchronous>, transform_indices = @transform_4, window_bounds = array<i64: 4, 32, 8>}, {pipeline_mode = #tpu.pipeline_mode<synchronous>, transform_indices = @transform_5, window_bounds = array<i64: 4, 32, 8>}, {pipeline_mode = #tpu.pipeline_mode<synchronous>, transform_indices = @transform_6, window_bounds = array<i64: 32, 32>}, {transform_indices = @transform_7, window_bounds = array<i64: 1, 8, 32>}]} {
    %c0 = arith.constant 0 : index
    %c0_0 = arith.constant 0 : index
    %c0_1 = arith.constant 0 : index
    %0 = vector.load %arg2[%c0, %c0_0, %c0_1] : memref<1x8x32xf32, #tpu.memory_space<vmem>>, vector<1x8x32xf32>
    %1 = vector.shape_cast %0 : vector<1x8x32xf32> to vector<8x32xf32>
    %c0_2 = arith.constant 0 : index
    %c0_3 = arith.constant 0 : index
    %c0_4 = arith.constant 0 : index
    %2 = vector.load %arg3[%c0_2, %c0_3, %c0_4] : memref<1x16x32xf32, #tpu.memory_space<vmem>>, vector<1x16x32xf32>
    %3 = vector.shape_cast %2 : vector<1x16x32xf32> to vector<16x32xf32>
    %4 = arith.mulf %1, %1 : vector<8x32xf32>
    %cst = arith.constant dense<0.000000e+00> : vector<8xf32>
    %5 = vector.multi_reduction <add>, %4, %cst [1] : vector<8x32xf32> to vector<8xf32>
    %6 = vector.shape_cast %5 : vector<8xf32> to vector<8x1xf32>
    %cst_5 = arith.constant 3.200000e+01 : f32
    %7 = vector.broadcast %cst_5 : f32 to vector<8x1xf32>
    %8 = arith.divf %6, %7 : vector<8x1xf32>
    %cst_6 = arith.constant 9.99999997E-7 : f32
    %9 = vector.broadcast %cst_6 : f32 to vector<8x1xf32>
    %10 = arith.addf %8, %9 : vector<8x1xf32>
    %11 = math.rsqrt %10 : vector<8x1xf32>
    %12 = vector.broadcast %11 : vector<8x1xf32> to vector<8x32xf32>
    %13 = arith.mulf %1, %12 : vector<8x32xf32>
    %c0_7 = arith.constant 0 : index
    %c0_8 = arith.constant 0 : index
    %14 = vector.load %arg4[%c0_7, %c0_8] : memref<1x32xf32, #tpu.memory_space<vmem>>, vector<1x32xf32>
    %15 = vector.broadcast %14 : vector<1x32xf32> to vector<8x32xf32>
    %16 = arith.mulf %13, %15 : vector<8x32xf32>
    %c0_9 = arith.constant 0 : index
    %c0_10 = arith.constant 0 : index
    %c0_11 = arith.constant 0 : index
    %17 = vector.load %arg5[%c0_9, %c0_10, %c0_11] : memref<4x32x8xf32, #tpu.memory_space<vmem>>, vector<1x32x8xf32>
    %18 = vector.shape_cast %17 : vector<1x32x8xf32> to vector<32x8xf32>
    %cst_12 = arith.constant dense<0.000000e+00> : vector<8x8xf32>
    %19 = tpu.matmul %16, %18, %cst_12 {dimension_numbers = #tpu.dot_dimension_numbers<[1], [0], [0], [1], [0, 0, 1, 1], [], []>} : vector<8x32xf32>, vector<32x8xf32>, vector<8x8xf32> -> vector<8x8xf32>
    %c0_13 = arith.constant 0 : index
    %c0_14 = arith.constant 0 : index
    %c0_15 = arith.constant 0 : index
    %20 = vector.load %arg6[%c0_13, %c0_14, %c0_15] : memref<4x32x8xf32, #tpu.memory_space<vmem>>, vector<1x32x8xf32>
    %21 = vector.shape_cast %20 : vector<1x32x8xf32> to vector<32x8xf32>
    %cst_16 = arith.constant dense<0.000000e+00> : vector<16x8xf32>
    %22 = tpu.matmul %3, %21, %cst_16 {dimension_numbers = #tpu.dot_dimension_numbers<[1], [0], [0], [1], [0, 0, 1, 1], [], []>} : vector<16x32xf32>, vector<32x8xf32>, vector<16x8xf32> -> vector<16x8xf32>
    %c0_17 = arith.constant 0 : index
    %c0_18 = arith.constant 0 : index
    %c0_19 = arith.constant 0 : index
    %23 = vector.load %arg7[%c0_17, %c0_18, %c0_19] : memref<4x32x8xf32, #tpu.memory_space<vmem>>, vector<1x32x8xf32>
    %24 = vector.shape_cast %23 : vector<1x32x8xf32> to vector<32x8xf32>
    %cst_20 = arith.constant dense<0.000000e+00> : vector<16x8xf32>
    %25 = tpu.matmul %3, %24, %cst_20 {dimension_numbers = #tpu.dot_dimension_numbers<[1], [0], [0], [1], [0, 0, 1, 1], [], []>} : vector<16x32xf32>, vector<32x8xf32>, vector<16x8xf32> -> vector<16x8xf32>
    %cst_21 = arith.constant dense<0.000000e+00> : vector<8x16xf32>
    %26 = tpu.matmul %19, %22, %cst_21 {dimension_numbers = #tpu.dot_dimension_numbers<[1], [1], [0], [0], [0, 0, 1, 0], [], []>} : vector<8x8xf32>, vector<16x8xf32>, vector<8x16xf32> -> vector<8x16xf32>
    %cst_22 = arith.constant dense<0xFF800000> : vector<8xf32>
    %27 = vector.multi_reduction <maximumf>, %26, %cst_22 [1] : vector<8x16xf32> to vector<8xf32>
    %28 = vector.shape_cast %27 : vector<8xf32> to vector<8x1xf32>
    %29 = vector.broadcast %28 : vector<8x1xf32> to vector<8x16xf32>
    %30 = arith.subf %26, %29 : vector<8x16xf32>
    %31 = math.exp %30 : vector<8x16xf32>
    %cst_23 = arith.constant dense<0.000000e+00> : vector<8xf32>
    %32 = vector.multi_reduction <add>, %31, %cst_23 [1] : vector<8x16xf32> to vector<8xf32>
    %33 = vector.shape_cast %32 : vector<8xf32> to vector<8x1xf32>
    %34 = tpu.reciprocal %33 : vector<8x1xf32> -> vector<8x1xf32>
    %35 = vector.broadcast %34 : vector<8x1xf32> to vector<8x16xf32>
    %36 = arith.mulf %31, %35 : vector<8x16xf32>
    %cst_24 = arith.constant dense<0.000000e+00> : vector<8x8xf32>
    %37 = tpu.matmul %36, %25, %cst_24 {dimension_numbers = #tpu.dot_dimension_numbers<[1], [0], [0], [1], [0, 0, 1, 1], [], []>} : vector<8x16xf32>, vector<16x8xf32>, vector<8x8xf32> -> vector<8x8xf32>
    %c0_25 = arith.constant 0 : index
    %c0_26 = arith.constant 0 : index
    %38 = vector.load %arg10[%c0_25, %c0_26] : memref<8x32xf32, #tpu.memory_space<vmem>>, vector<8x8xf32>
    tpu.vector_store %arg10[%c0_25, %c0_26], %37 {strides = array<i32>} : memref<8x32xf32, #tpu.memory_space<vmem>>, vector<8x8xf32>,
    %c1 = arith.constant 1 : index
    %c0_27 = arith.constant 0 : index
    %c0_28 = arith.constant 0 : index
    %39 = vector.load %arg5[%c1, %c0_27, %c0_28] : memref<4x32x8xf32, #tpu.memory_space<vmem>>, vector<1x32x8xf32>
    %40 = vector.shape_cast %39 : vector<1x32x8xf32> to vector<32x8xf32>
    %cst_29 = arith.constant dense<0.000000e+00> : vector<8x8xf32>
    %41 = tpu.matmul %16, %40, %cst_29 {dimension_numbers = #tpu.dot_dimension_numbers<[1], [0], [0], [1], [0, 0, 1, 1], [], []>} : vector<8x32xf32>, vector<32x8xf32>, vector<8x8xf32> -> vector<8x8xf32>
    %c1_30 = arith.constant 1 : index
    %c0_31 = arith.constant 0 : index
    %c0_32 = arith.constant 0 : index
    %42 = vector.load %arg6[%c1_30, %c0_31, %c0_32] : memref<4x32x8xf32, #tpu.memory_space<vmem>>, vector<1x32x8xf32>
    %43 = vector.shape_cast %42 : vector<1x32x8xf32> to vector<32x8xf32>
    %cst_33 = arith.constant dense<0.000000e+00> : vector<16x8xf32>
    %44 = tpu.matmul %3, %43, %cst_33 {dimension_numbers = #tpu.dot_dimension_numbers<[1], [0], [0], [1], [0, 0, 1, 1], [], []>} : vector<16x32xf32>, vector<32x8xf32>, vector<16x8xf32> -> vector<16x8xf32>
    %c1_34 = arith.constant 1 : index
    %c0_35 = arith.constant 0 : index
    %c0_36 = arith.constant 0 : index
    %45 = vector.load %arg7[%c1_34, %c0_35, %c0_36] : memref<4x32x8xf32, #tpu.memory_space<vmem>>, vector<1x32x8xf32>
    %46 = vector.shape_cast %45 : vector<1x32x8xf32> to vector<32x8xf32>
    %cst_37 = arith.constant dense<0.000000e+00> : vector<16x8xf32>
    %47 = tpu.matmul %3, %46, %cst_37 {dimension_numbers = #tpu.dot_dimension_numbers<[1], [0], [0], [1], [0, 0, 1, 1], [], []>} : vector<16x32xf32>, vector<32x8xf32>, vector<16x8xf32> -> vector<16x8xf32>
    %cst_38 = arith.constant dense<0.000000e+00> : vector<8x16xf32>
    %48 = tpu.matmul %41, %44, %cst_38 {dimension_numbers = #tpu.dot_dimension_numbers<[1], [1], [0], [0], [0, 0, 1, 0], [], []>} : vector<8x8xf32>, vector<16x8xf32>, vector<8x16xf32> -> vector<8x16xf32>
    %cst_39 = arith.constant dense<0xFF800000> : vector<8xf32>
    %49 = vector.multi_reduction <maximumf>, %48, %cst_39 [1] : vector<8x16xf32> to vector<8xf32>
    %50 = vector.shape_cast %49 : vector<8xf32> to vector<8x1xf32>
    %51 = vector.broadcast %50 : vector<8x1xf32> to vector<8x16xf32>
    %52 = arith.subf %48, %51 : vector<8x16xf32>
    %53 = math.exp %52 : vector<8x16xf32>
    %cst_40 = arith.constant dense<0.000000e+00> : vector<8xf32>
    %54 = vector.multi_reduction <add>, %53, %cst_40 [1] : vector<8x16xf32> to vector<8xf32>
    %55 = vector.shape_cast %54 : vector<8xf32> to vector<8x1xf32>
    %56 = tpu.reciprocal %55 : vector<8x1xf32> -> vector<8x1xf32>
    %57 = vector.broadcast %56 : vector<8x1xf32> to vector<8x16xf32>
    %58 = arith.mulf %53, %57 : vector<8x16xf32>
    %cst_41 = arith.constant dense<0.000000e+00> : vector<8x8xf32>
    %59 = tpu.matmul %58, %47, %cst_41 {dimension_numbers = #tpu.dot_dimension_numbers<[1], [0], [0], [1], [0, 0, 1, 1], [], []>} : vector<8x16xf32>, vector<16x8xf32>, vector<8x8xf32> -> vector<8x8xf32>
    %c0_42 = arith.constant 0 : index
    %c8 = arith.constant 8 : index
    %60 = vector.load %arg10[%c0_42, %c8] : memref<8x32xf32, #tpu.memory_space<vmem>>, vector<8x8xf32>
    tpu.vector_store %arg10[%c0_42, %c8], %59 {strides = array<i32>} : memref<8x32xf32, #tpu.memory_space<vmem>>, vector<8x8xf32>,
    %c2 = arith.constant 2 : index
    %c0_43 = arith.constant 0 : index
    %c0_44 = arith.constant 0 : index
    %61 = vector.load %arg5[%c2, %c0_43, %c0_44] : memref<4x32x8xf32, #tpu.memory_space<vmem>>, vector<1x32x8xf32>
    %62 = vector.shape_cast %61 : vector<1x32x8xf32> to vector<32x8xf32>
    %cst_45 = arith.constant dense<0.000000e+00> : vector<8x8xf32>
    %63 = tpu.matmul %16, %62, %cst_45 {dimension_numbers = #tpu.dot_dimension_numbers<[1], [0], [0], [1], [0, 0, 1, 1], [], []>} : vector<8x32xf32>, vector<32x8xf32>, vector<8x8xf32> -> vector<8x8xf32>
    %c2_46 = arith.constant 2 : index
    %c0_47 = arith.constant 0 : index
    %c0_48 = arith.constant 0 : index
    %64 = vector.load %arg6[%c2_46, %c0_47, %c0_48] : memref<4x32x8xf32, #tpu.memory_space<vmem>>, vector<1x32x8xf32>
    %65 = vector.shape_cast %64 : vector<1x32x8xf32> to vector<32x8xf32>
    %cst_49 = arith.constant dense<0.000000e+00> : vector<16x8xf32>
    %66 = tpu.matmul %3, %65, %cst_49 {dimension_numbers = #tpu.dot_dimension_numbers<[1], [0], [0], [1], [0, 0, 1, 1], [], []>} : vector<16x32xf32>, vector<32x8xf32>, vector<16x8xf32> -> vector<16x8xf32>
    %c2_50 = arith.constant 2 : index
    %c0_51 = arith.constant 0 : index
    %c0_52 = arith.constant 0 : index
    %67 = vector.load %arg7[%c2_50, %c0_51, %c0_52] : memref<4x32x8xf32, #tpu.memory_space<vmem>>, vector<1x32x8xf32>
    %68 = vector.shape_cast %67 : vector<1x32x8xf32> to vector<32x8xf32>
    %cst_53 = arith.constant dense<0.000000e+00> : vector<16x8xf32>
    %69 = tpu.matmul %3, %68, %cst_53 {dimension_numbers = #tpu.dot_dimension_numbers<[1], [0], [0], [1], [0, 0, 1, 1], [], []>} : vector<16x32xf32>, vector<32x8xf32>, vector<16x8xf32> -> vector<16x8xf32>
    %cst_54 = arith.constant dense<0.000000e+00> : vector<8x16xf32>
    %70 = tpu.matmul %63, %66, %cst_54 {dimension_numbers = #tpu.dot_dimension_numbers<[1], [1], [0], [0], [0, 0, 1, 0], [], []>} : vector<8x8xf32>, vector<16x8xf32>, vector<8x16xf32> -> vector<8x16xf32>
    %cst_55 = arith.constant dense<0xFF800000> : vector<8xf32>
    %71 = vector.multi_reduction <maximumf>, %70, %cst_55 [1] : vector<8x16xf32> to vector<8xf32>
    %72 = vector.shape_cast %71 : vector<8xf32> to vector<8x1xf32>
    %73 = vector.broadcast %72 : vector<8x1xf32> to vector<8x16xf32>
    %74 = arith.subf %70, %73 : vector<8x16xf32>
    %75 = math.exp %74 : vector<8x16xf32>
    %cst_56 = arith.constant dense<0.000000e+00> : vector<8xf32>
    %76 = vector.multi_reduction <add>, %75, %cst_56 [1] : vector<8x16xf32> to vector<8xf32>
    %77 = vector.shape_cast %76 : vector<8xf32> to vector<8x1xf32>
    %78 = tpu.reciprocal %77 : vector<8x1xf32> -> vector<8x1xf32>
    %79 = vector.broadcast %78 : vector<8x1xf32> to vector<8x16xf32>
    %80 = arith.mulf %75, %79 : vector<8x16xf32>
    %cst_57 = arith.constant dense<0.000000e+00> : vector<8x8xf32>
    %81 = tpu.matmul %80, %69, %cst_57 {dimension_numbers = #tpu.dot_dimension_numbers<[1], [0], [0], [1], [0, 0, 1, 1], [], []>} : vector<8x16xf32>, vector<16x8xf32>, vector<8x8xf32> -> vector<8x8xf32>
    %c0_58 = arith.constant 0 : index
    %c16 = arith.constant 16 : index
    %82 = vector.load %arg10[%c0_58, %c16] : memref<8x32xf32, #tpu.memory_space<vmem>>, vector<8x8xf32>
    tpu.vector_store %arg10[%c0_58, %c16], %81 {strides = array<i32>} : memref<8x32xf32, #tpu.memory_space<vmem>>, vector<8x8xf32>,
    %c3 = arith.constant 3 : index
    %c0_59 = arith.constant 0 : index
    %c0_60 = arith.constant 0 : index
    %83 = vector.load %arg5[%c3, %c0_59, %c0_60] : memref<4x32x8xf32, #tpu.memory_space<vmem>>, vector<1x32x8xf32>
    %84 = vector.shape_cast %83 : vector<1x32x8xf32> to vector<32x8xf32>
    %cst_61 = arith.constant dense<0.000000e+00> : vector<8x8xf32>
    %85 = tpu.matmul %16, %84, %cst_61 {dimension_numbers = #tpu.dot_dimension_numbers<[1], [0], [0], [1], [0, 0, 1, 1], [], []>} : vector<8x32xf32>, vector<32x8xf32>, vector<8x8xf32> -> vector<8x8xf32>
    %c3_62 = arith.constant 3 : index
    %c0_63 = arith.constant 0 : index
    %c0_64 = arith.constant 0 : index
    %86 = vector.load %arg6[%c3_62, %c0_63, %c0_64] : memref<4x32x8xf32, #tpu.memory_space<vmem>>, vector<1x32x8xf32>
    %87 = vector.shape_cast %86 : vector<1x32x8xf32> to vector<32x8xf32>
    %cst_65 = arith.constant dense<0.000000e+00> : vector<16x8xf32>
    %88 = tpu.matmul %3, %87, %cst_65 {dimension_numbers = #tpu.dot_dimension_numbers<[1], [0], [0], [1], [0, 0, 1, 1], [], []>} : vector<16x32xf32>, vector<32x8xf32>, vector<16x8xf32> -> vector<16x8xf32>
    %c3_66 = arith.constant 3 : index
    %c0_67 = arith.constant 0 : index
    %c0_68 = arith.constant 0 : index
    %89 = vector.load %arg7[%c3_66, %c0_67, %c0_68] : memref<4x32x8xf32, #tpu.memory_space<vmem>>, vector<1x32x8xf32>
    %90 = vector.shape_cast %89 : vector<1x32x8xf32> to vector<32x8xf32>
    %cst_69 = arith.constant dense<0.000000e+00> : vector<16x8xf32>
    %91 = tpu.matmul %3, %90, %cst_69 {dimension_numbers = #tpu.dot_dimension_numbers<[1], [0], [0], [1], [0, 0, 1, 1], [], []>} : vector<16x32xf32>, vector<32x8xf32>, vector<16x8xf32> -> vector<16x8xf32>
    %cst_70 = arith.constant dense<0.000000e+00> : vector<8x16xf32>
    %92 = tpu.matmul %85, %88, %cst_70 {dimension_numbers = #tpu.dot_dimension_numbers<[1], [1], [0], [0], [0, 0, 1, 0], [], []>} : vector<8x8xf32>, vector<16x8xf32>, vector<8x16xf32> -> vector<8x16xf32>
    %cst_71 = arith.constant dense<0xFF800000> : vector<8xf32>
    %93 = vector.multi_reduction <maximumf>, %92, %cst_71 [1] : vector<8x16xf32> to vector<8xf32>
    %94 = vector.shape_cast %93 : vector<8xf32> to vector<8x1xf32>
    %95 = vector.broadcast %94 : vector<8x1xf32> to vector<8x16xf32>
    %96 = arith.subf %92, %95 : vector<8x16xf32>
    %97 = math.exp %96 : vector<8x16xf32>
    %cst_72 = arith.constant dense<0.000000e+00> : vector<8xf32>
    %98 = vector.multi_reduction <add>, %97, %cst_72 [1] : vector<8x16xf32> to vector<8xf32>
    %99 = vector.shape_cast %98 : vector<8xf32> to vector<8x1xf32>
    %100 = tpu.reciprocal %99 : vector<8x1xf32> -> vector<8x1xf32>
    %101 = vector.broadcast %100 : vector<8x1xf32> to vector<8x16xf32>
    %102 = arith.mulf %97, %101 : vector<8x16xf32>
    %cst_73 = arith.constant dense<0.000000e+00> : vector<8x8xf32>
    %103 = tpu.matmul %102, %91, %cst_73 {dimension_numbers = #tpu.dot_dimension_numbers<[1], [0], [0], [1], [0, 0, 1, 1], [], []>} : vector<8x16xf32>, vector<16x8xf32>, vector<8x8xf32> -> vector<8x8xf32>
    %c0_74 = arith.constant 0 : index
    %c24 = arith.constant 24 : index
    %104 = vector.load %arg10[%c0_74, %c24] : memref<8x32xf32, #tpu.memory_space<vmem>>, vector<8x8xf32>
    tpu.vector_store %arg10[%c0_74, %c24], %103 {strides = array<i32>} : memref<8x32xf32, #tpu.memory_space<vmem>>, vector<8x8xf32>,
    %c0_75 = arith.constant 0 : index
    %c0_76 = arith.constant 0 : index
    %105 = vector.load %arg10[%c0_75, %c0_76] : memref<8x32xf32, #tpu.memory_space<vmem>>, vector<8x32xf32>
    %c0_77 = arith.constant 0 : index
    %c0_78 = arith.constant 0 : index
    %106 = vector.load %arg8[%c0_77, %c0_78] : memref<32x32xf32, #tpu.memory_space<vmem>>, vector<32x32xf32>
    %cst_79 = arith.constant dense<0.000000e+00> : vector<8x32xf32>
    %107 = tpu.matmul %105, %106, %cst_79 {dimension_numbers = #tpu.dot_dimension_numbers<[1], [0], [0], [1], [0, 0, 1, 1], [], []>} : vector<8x32xf32>, vector<32x32xf32>, vector<8x32xf32> -> vector<8x32xf32>
    %108 = arith.addf %1, %107 : vector<8x32xf32>
    %c0_80 = arith.constant 0 : index
    %c0_81 = arith.constant 0 : index
    %c0_82 = arith.constant 0 : index
    %109 = vector.load %arg9[%c0_80, %c0_81, %c0_82] : memref<1x8x32xf32, #tpu.memory_space<vmem>>, vector<1x8x32xf32>
    %110 = vector.shape_cast %109 : vector<1x8x32xf32> to vector<8x32xf32>
    %111 = vector.shape_cast %108 : vector<8x32xf32> to vector<1x8x32xf32>
    tpu.vector_store %arg9[%c0_80, %c0_81, %c0_82], %111 {strides = array<i32>} : memref<1x8x32xf32, #tpu.memory_space<vmem>>, vector<1x8x32xf32>,
    return
  }
  func.func @transform_0(%arg0: i32, %arg1: i32) -> (i32, i32, i32) {
    %c0_i32 = arith.constant 0 : i32
    %c0_i32_0 = arith.constant 0 : i32
    return %arg0, %arg1, %c0_i32 : i32, i32, i32
  }
  func.func @transform_1(%arg0: i32, %arg1: i32) -> (i32, i32, i32) {
    %c0_i32 = arith.constant 0 : i32
    %c0_i32_0 = arith.constant 0 : i32
    %c0_i32_1 = arith.constant 0 : i32
    return %arg0, %c0_i32, %c0_i32_0 : i32, i32, i32
  }
  func.func @transform_2(%arg0: i32, %arg1: i32) -> (i32, i32) {
    %c0_i32 = arith.constant 0 : i32
    %c0_i32_0 = arith.constant 0 : i32
    %c0_i32_1 = arith.constant 0 : i32
    return %c0_i32, %c0_i32_0 : i32, i32
  }
  func.func @transform_3(%arg0: i32, %arg1: i32) -> (i32, i32, i32) {
    %c0_i32 = arith.constant 0 : i32
    %c0_i32_0 = arith.constant 0 : i32
    %c0_i32_1 = arith.constant 0 : i32
    %c0_i32_2 = arith.constant 0 : i32
    return %c0_i32, %c0_i32_0, %c0_i32_1 : i32, i32, i32
  }
  func.func @transform_4(%arg0: i32, %arg1: i32) -> (i32, i32, i32) {
    %c0_i32 = arith.constant 0 : i32
    %c0_i32_0 = arith.constant 0 : i32
    %c0_i32_1 = arith.constant 0 : i32
    %c0_i32_2 = arith.constant 0 : i32
    return %c0_i32, %c0_i32_0, %c0_i32_1 : i32, i32, i32
  }
  func.func @transform_5(%arg0: i32, %arg1: i32) -> (i32, i32, i32) {
    %c0_i32 = arith.constant 0 : i32
    %c0_i32_0 = arith.constant 0 : i32
    %c0_i32_1 = arith.constant 0 : i32
    %c0_i32_2 = arith.constant 0 : i32
    return %c0_i32, %c0_i32_0, %c0_i32_1 : i32, i32, i32
  }
  func.func @transform_6(%arg0: i32, %arg1: i32) -> (i32, i32) {
    %c0_i32 = arith.constant 0 : i32
    %c0_i32_0 = arith.constant 0 : i32
    %c0_i32_1 = arith.constant 0 : i32
    return %c0_i32, %c0_i32_0 : i32, i32
  }
  func.func @transform_7(%arg0: i32, %arg1: i32) -> (i32, i32, i32) {
    %c0_i32 = arith.constant 0 : i32
    %c0_i32_0 = arith.constant 0 : i32
    return %arg0, %arg1, %c0_i32 : i32, i32, i32
  }
}

module attributes {stable_mosaic.version = 11 : i64} {
  func.func @_cross_attn_kernel(%arg0: i32, %arg1: i32, %arg2: memref<1x8x32xf32, #tpu.memory_space<vmem>>, %arg3: memref<1x16x32xf32, #tpu.memory_space<vmem>>, %arg4: memref<1x32xf32, #tpu.memory_space<vmem>>, %arg5: memref<4x32x8xf32, #tpu.memory_space<vmem>>, %arg6: memref<4x32x8xf32, #tpu.memory_space<vmem>>, %arg7: memref<4x32x8xf32, #tpu.memory_space<vmem>>, %arg8: memref<32x32xf32, #tpu.memory_space<vmem>>, %arg9: memref<1x8x32xf32, #tpu.memory_space<vmem>>, %arg10: memref<8x32xf32, #tpu.memory_space<vmem>>) attributes {dimension_semantics = [#tpu.dimension_semantics<parallel>, #tpu.dimension_semantics<parallel>], iteration_bounds = array<i64: 2, 1>, scalar_prefetch = 0 : i64, scratch_operands = 1 : i64, tpu.core_type = #tpu.core_type<tc>, window_params = [{transform_indices = @transform_0, window_bounds = array<i64: 1, 8, 32>}, {transform_indices = @transform_1, window_bounds = array<i64: 1, 16, 32>}, {pipeline_mode = #tpu.pipeline_mode<synchronous>, transform_indices = @transform_2, window_bounds = array<i64: 1, 32>}, {pipeline_mode = #tpu.pipeline_mode<synchronous>, transform_indices = @transform_3, window_bounds = array<i64: 4, 32, 8>}, {pipeline_mode = #tpu.pipeline_mode<synchronous>, transform_indices = @transform_4, window_bounds = array<i64: 4, 32, 8>}, {pipeline_mode = #tpu.pipeline_mode<synchronous>, transform_indices = @transform_5, window_bounds = array<i64: 4, 32, 8>}, {pipeline_mode = #tpu.pipeline_mode<synchronous>, transform_indices = @transform_6, window_bounds = array<i64: 32, 32>}, {transform_indices = @transform_7, window_bounds = array<i64: 1, 8, 32>}]} {
    %c0 = arith.constant 0 : index
    %c0_0 = arith.constant 0 : index
    %c0_1 = arith.constant 0 : index
    %0 = vector.load %arg2[%c0, %c0_0, %c0_1] : memref<1x8x32xf32, #tpu.memory_space<vmem>>, vector<1x8x32xf32>
    %1 = vector.shape_cast %0 : vector<1x8x32xf32> to vector<8x32xf32>
    %c0_2 = arith.constant 0 : index
    %c0_3 = arith.constant 0 : index
    %c0_4 = arith.constant 0 : index
    %2 = vector.load %arg3[%c0_2, %c0_3, %c0_4] : memref<1x16x32xf32, #tpu.memory_space<vmem>>, vector<1x16x32xf32>
    %3 = vector.shape_cast %2 : vector<1x16x32xf32> to vector<16x32xf32>
    %4 = arith.mulf %1, %1 : vector<8x32xf32>
    %cst = arith.constant dense<0.000000e+00> : vector<8xf32>
    %5 = vector.multi_reduction <add>, %4, %cst [1] : vector<8x32xf32> to vector<8xf32>
    %6 = vector.shape_cast %5 : vector<8xf32> to vector<8x1xf32>
    %cst_5 = arith.constant 3.200000e+01 : f32
    %7 = vector.broadcast %cst_5 : f32 to vector<8x1xf32>
    %8 = arith.divf %6, %7 : vector<8x1xf32>
    %cst_6 = arith.constant 9.99999997E-7 : f32
    %9 = vector.broadcast %cst_6 : f32 to vector<8x1xf32>
    %10 = arith.addf %8, %9 : vector<8x1xf32>
    %11 = math.rsqrt %10 : vector<8x1xf32>
    %12 = vector.broadcast %11 : vector<8x1xf32> to vector<8x32xf32>
    %13 = arith.mulf %1, %12 : vector<8x32xf32>
    %c0_7 = arith.constant 0 : index
    %c0_8 = arith.constant 0 : index
    %14 = vector.load %arg4[%c0_7, %c0_8] : memref<1x32xf32, #tpu.memory_space<vmem>>, vector<1x32xf32>
    %15 = vector.broadcast %14 : vector<1x32xf32> to vector<8x32xf32>
    %16 = arith.mulf %13, %15 : vector<8x32xf32>
    %c0_9 = arith.constant 0 : index
    %c0_10 = arith.constant 0 : index
    %c0_11 = arith.constant 0 : index
    %17 = vector.load %arg5[%c0_9, %c0_10, %c0_11] : memref<4x32x8xf32, #tpu.memory_space<vmem>>, vector<1x32x8xf32>
    %18 = vector.shape_cast %17 : vector<1x32x8xf32> to vector<32x8xf32>
    %cst_12 = arith.constant dense<0.000000e+00> : vector<8x8xf32>
    %19 = tpu.matmul %16, %18, %cst_12 {dimension_numbers = #tpu.dot_dimension_numbers<[1], [0], [0], [1], [0, 0, 1, 1], [], []>} : vector<8x32xf32>, vector<32x8xf32>, vector<8x8xf32> -> vector<8x8xf32>
    %c0_13 = arith.constant 0 : index
    %c0_14 = arith.constant 0 : index
    %c0_15 = arith.constant 0 : index
    %20 = vector.load %arg6[%c0_13, %c0_14, %c0_15] : memref<4x32x8xf32, #tpu.memory_space<vmem>>, vector<1x32x8xf32>
    %21 = vector.shape_cast %20 : vector<1x32x8xf32> to vector<32x8xf32>
    %cst_16 = arith.constant dense<0.000000e+00> : vector<16x8xf32>
    %22 = tpu.matmul %3, %21, %cst_16 {dimension_numbers = #tpu.dot_dimension_numbers<[1], [0], [0], [1], [0, 0, 1, 1], [], []>} : vector<16x32xf32>, vector<32x8xf32>, vector<16x8xf32> -> vector<16x8xf32>
    %c0_17 = arith.constant 0 : index
    %c0_18 = arith.constant 0 : index
    %c0_19 = arith.constant 0 : index
    %23 = vector.load %arg7[%c0_17, %c0_18, %c0_19] : memref<4x32x8xf32, #tpu.memory_space<vmem>>, vector<1x32x8xf32>
    %24 = vector.shape_cast %23 : vector<1x32x8xf32> to vector<32x8xf32>
    %cst_20 = arith.constant dense<0.000000e+00> : vector<16x8xf32>
    %25 = tpu.matmul %3, %24, %cst_20 {dimension_numbers = #tpu.dot_dimension_numbers<[1], [0], [0], [1], [0, 0, 1, 1], [], []>} : vector<16x32xf32>, vector<32x8xf32>, vector<16x8xf32> -> vector<16x8xf32>
    %cst_21 = arith.constant dense<0.000000e+00> : vector<8x16xf32>
    %26 = tpu.matmul %19, %22, %cst_21 {dimension_numbers = #tpu.dot_dimension_numbers<[1], [1], [0], [0], [0, 0, 1, 0], [], []>} : vector<8x8xf32>, vector<16x8xf32>, vector<8x16xf32> -> vector<8x16xf32>
    %cst_22 = arith.constant dense<0xFF800000> : vector<8xf32>
    %27 = vector.multi_reduction <maximumf>, %26, %cst_22 [1] : vector<8x16xf32> to vector<8xf32>
    %28 = vector.shape_cast %27 : vector<8xf32> to vector<8x1xf32>
    %29 = vector.broadcast %28 : vector<8x1xf32> to vector<8x16xf32>
    %30 = arith.subf %26, %29 : vector<8x16xf32>
    %31 = math.exp %30 : vector<8x16xf32>
    %cst_23 = arith.constant dense<0.000000e+00> : vector<8xf32>
    %32 = vector.multi_reduction <add>, %31, %cst_23 [1] : vector<8x16xf32> to vector<8xf32>
    %33 = vector.shape_cast %32 : vector<8xf32> to vector<8x1xf32>
    %34 = tpu.reciprocal %33 : vector<8x1xf32> -> vector<8x1xf32>
    %35 = vector.broadcast %34 : vector<8x1xf32> to vector<8x16xf32>
    %36 = arith.mulf %31, %35 : vector<8x16xf32>
    %cst_24 = arith.constant dense<0.000000e+00> : vector<8x8xf32>
    %37 = tpu.matmul %36, %25, %cst_24 {dimension_numbers = #tpu.dot_dimension_numbers<[1], [0], [0], [1], [0, 0, 1, 1], [], []>} : vector<8x16xf32>, vector<16x8xf32>, vector<8x8xf32> -> vector<8x8xf32>
    %c0_25 = arith.constant 0 : index
    %c0_26 = arith.constant 0 : index
    %38 = vector.load %arg10[%c0_25, %c0_26] : memref<8x32xf32, #tpu.memory_space<vmem>>, vector<8x8xf32>
    tpu.vector_store %arg10[%c0_25, %c0_26], %37 {strides = array<i32>} : memref<8x32xf32, #tpu.memory_space<vmem>>, vector<8x8xf32>,
    %c1 = arith.constant 1 : index
    %c0_27 = arith.constant 0 : index
    %c0_28 = arith.constant 0 : index
    %39 = vector.load %arg5[%c1, %c0_27, %c0_28] : memref<4x32x8xf32, #tpu.memory_space<vmem>>, vector<1x32x8xf32>
    %40 = vector.shape_cast %39 : vector<1x32x8xf32> to vector<32x8xf32>
    %cst_29 = arith.constant dense<0.000000e+00> : vector<8x8xf32>
    %41 = tpu.matmul %16, %40, %cst_29 {dimension_numbers = #tpu.dot_dimension_numbers<[1], [0], [0], [1], [0, 0, 1, 1], [], []>} : vector<8x32xf32>, vector<32x8xf32>, vector<8x8xf32> -> vector<8x8xf32>
    %c1_30 = arith.constant 1 : index
    %c0_31 = arith.constant 0 : index
    %c0_32 = arith.constant 0 : index
    %42 = vector.load %arg6[%c1_30, %c0_31, %c0_32] : memref<4x32x8xf32, #tpu.memory_space<vmem>>, vector<1x32x8xf32>
    %43 = vector.shape_cast %42 : vector<1x32x8xf32> to vector<32x8xf32>
    %cst_33 = arith.constant dense<0.000000e+00> : vector<16x8xf32>
    %44 = tpu.matmul %3, %43, %cst_33 {dimension_numbers = #tpu.dot_dimension_numbers<[1], [0], [0], [1], [0, 0, 1, 1], [], []>} : vector<16x32xf32>, vector<32x8xf32>, vector<16x8xf32> -> vector<16x8xf32>
    %c1_34 = arith.constant 1 : index
    %c0_35 = arith.constant 0 : index
    %c0_36 = arith.constant 0 : index
    %45 = vector.load %arg7[%c1_34, %c0_35, %c0_36] : memref<4x32x8xf32, #tpu.memory_space<vmem>>, vector<1x32x8xf32>
    %46 = vector.shape_cast %45 : vector<1x32x8xf32> to vector<32x8xf32>
    %cst_37 = arith.constant dense<0.000000e+00> : vector<16x8xf32>
    %47 = tpu.matmul %3, %46, %cst_37 {dimension_numbers = #tpu.dot_dimension_numbers<[1], [0], [0], [1], [0, 0, 1, 1], [], []>} : vector<16x32xf32>, vector<32x8xf32>, vector<16x8xf32> -> vector<16x8xf32>
    %cst_38 = arith.constant dense<0.000000e+00> : vector<8x16xf32>
    %48 = tpu.matmul %41, %44, %cst_38 {dimension_numbers = #tpu.dot_dimension_numbers<[1], [1], [0], [0], [0, 0, 1, 0], [], []>} : vector<8x8xf32>, vector<16x8xf32>, vector<8x16xf32> -> vector<8x16xf32>
    %cst_39 = arith.constant dense<0xFF800000> : vector<8xf32>
    %49 = vector.multi_reduction <maximumf>, %48, %cst_39 [1] : vector<8x16xf32> to vector<8xf32>
    %50 = vector.shape_cast %49 : vector<8xf32> to vector<8x1xf32>
    %51 = vector.broadcast %50 : vector<8x1xf32> to vector<8x16xf32>
    %52 = arith.subf %48, %51 : vector<8x16xf32>
    %53 = math.exp %52 : vector<8x16xf32>
    %cst_40 = arith.constant dense<0.000000e+00> : vector<8xf32>
    %54 = vector.multi_reduction <add>, %53, %cst_40 [1] : vector<8x16xf32> to vector<8xf32>
    %55 = vector.shape_cast %54 : vector<8xf32> to vector<8x1xf32>
    %56 = tpu.reciprocal %55 : vector<8x1xf32> -> vector<8x1xf32>
    %57 = vector.broadcast %56 : vector<8x1xf32> to vector<8x16xf32>
    %58 = arith.mulf %53, %57 : vector<8x16xf32>
    %cst_41 = arith.constant dense<0.000000e+00> : vector<8x8xf32>
    %59 = tpu.matmul %58, %47, %cst_41 {dimension_numbers = #tpu.dot_dimension_numbers<[1], [0], [0], [1], [0, 0, 1, 1], [], []>} : vector<8x16xf32>, vector<16x8xf32>, vector<8x8xf32> -> vector<8x8xf32>
    %c0_42 = arith.constant 0 : index
    %c8 = arith.constant 8 : index
    %60 = vector.load %arg10[%c0_42, %c8] : memref<8x32xf32, #tpu.memory_space<vmem>>, vector<8x8xf32>
    tpu.vector_store %arg10[%c0_42, %c8], %59 {strides = array<i32>} : memref<8x32xf32, #tpu.memory_space<vmem>>, vector<8x8xf32>,
    %c2 = arith.constant 2 : index
    %c0_43 = arith.constant 0 : index
    %c0_44 = arith.constant 0 : index
    %61 = vector.load %arg5[%c2, %c0_43, %c0_44] : memref<4x32x8xf32, #tpu.memory_space<vmem>>, vector<1x32x8xf32>
    %62 = vector.shape_cast %61 : vector<1x32x8xf32> to vector<32x8xf32>
    %cst_45 = arith.constant dense<0.000000e+00> : vector<8x8xf32>
    %63 = tpu.matmul %16, %62, %cst_45 {dimension_numbers = #tpu.dot_dimension_numbers<[1], [0], [0], [1], [0, 0, 1, 1], [], []>} : vector<8x32xf32>, vector<32x8xf32>, vector<8x8xf32> -> vector<8x8xf32>
    %c2_46 = arith.constant 2 : index
    %c0_47 = arith.constant 0 : index
    %c0_48 = arith.constant 0 : index
    %64 = vector.load %arg6[%c2_46, %c0_47, %c0_48] : memref<4x32x8xf32, #tpu.memory_space<vmem>>, vector<1x32x8xf32>
    %65 = vector.shape_cast %64 : vector<1x32x8xf32> to vector<32x8xf32>
    %cst_49 = arith.constant dense<0.000000e+00> : vector<16x8xf32>
    %66 = tpu.matmul %3, %65, %cst_49 {dimension_numbers = #tpu.dot_dimension_numbers<[1], [0], [0], [1], [0, 0, 1, 1], [], []>} : vector<16x32xf32>, vector<32x8xf32>, vector<16x8xf32> -> vector<16x8xf32>
    %c2_50 = arith.constant 2 : index
    %c0_51 = arith.constant 0 : index
    %c0_52 = arith.constant 0 : index
    %67 = vector.load %arg7[%c2_50, %c0_51, %c0_52] : memref<4x32x8xf32, #tpu.memory_space<vmem>>, vector<1x32x8xf32>
    %68 = vector.shape_cast %67 : vector<1x32x8xf32> to vector<32x8xf32>
    %cst_53 = arith.constant dense<0.000000e+00> : vector<16x8xf32>
    %69 = tpu.matmul %3, %68, %cst_53 {dimension_numbers = #tpu.dot_dimension_numbers<[1], [0], [0], [1], [0, 0, 1, 1], [], []>} : vector<16x32xf32>, vector<32x8xf32>, vector<16x8xf32> -> vector<16x8xf32>
    %cst_54 = arith.constant dense<0.000000e+00> : vector<8x16xf32>
    %70 = tpu.matmul %63, %66, %cst_54 {dimension_numbers = #tpu.dot_dimension_numbers<[1], [1], [0], [0], [0, 0, 1, 0], [], []>} : vector<8x8xf32>, vector<16x8xf32>, vector<8x16xf32> -> vector<8x16xf32>
    %cst_55 = arith.constant dense<0xFF800000> : vector<8xf32>
    %71 = vector.multi_reduction <maximumf>, %70, %cst_55 [1] : vector<8x16xf32> to vector<8xf32>
    %72 = vector.shape_cast %71 : vector<8xf32> to vector<8x1xf32>
    %73 = vector.broadcast %72 : vector<8x1xf32> to vector<8x16xf32>
    %74 = arith.subf %70, %73 : vector<8x16xf32>
    %75 = math.exp %74 : vector<8x16xf32>
    %cst_56 = arith.constant dense<0.000000e+00> : vector<8xf32>
    %76 = vector.multi_reduction <add>, %75, %cst_56 [1] : vector<8x16xf32> to vector<8xf32>
    %77 = vector.shape_cast %76 : vector<8xf32> to vector<8x1xf32>
    %78 = tpu.reciprocal %77 : vector<8x1xf32> -> vector<8x1xf32>
    %79 = vector.broadcast %78 : vector<8x1xf32> to vector<8x16xf32>
    %80 = arith.mulf %75, %79 : vector<8x16xf32>
    %cst_57 = arith.constant dense<0.000000e+00> : vector<8x8xf32>
    %81 = tpu.matmul %80, %69, %cst_57 {dimension_numbers = #tpu.dot_dimension_numbers<[1], [0], [0], [1], [0, 0, 1, 1], [], []>} : vector<8x16xf32>, vector<16x8xf32>, vector<8x8xf32> -> vector<8x8xf32>
    %c0_58 = arith.constant 0 : index
    %c16 = arith.constant 16 : index
    %82 = vector.load %arg10[%c0_58, %c16] : memref<8x32xf32, #tpu.memory_space<vmem>>, vector<8x8xf32>
    tpu.vector_store %arg10[%c0_58, %c16], %81 {strides = array<i32>} : memref<8x32xf32, #tpu.memory_space<vmem>>, vector<8x8xf32>,
    %c3 = arith.constant 3 : index
    %c0_59 = arith.constant 0 : index
    %c0_60 = arith.constant 0 : index
    %83 = vector.load %arg5[%c3, %c0_59, %c0_60] : memref<4x32x8xf32, #tpu.memory_space<vmem>>, vector<1x32x8xf32>
    %84 = vector.shape_cast %83 : vector<1x32x8xf32> to vector<32x8xf32>
    %cst_61 = arith.constant dense<0.000000e+00> : vector<8x8xf32>
    %85 = tpu.matmul %16, %84, %cst_61 {dimension_numbers = #tpu.dot_dimension_numbers<[1], [0], [0], [1], [0, 0, 1, 1], [], []>} : vector<8x32xf32>, vector<32x8xf32>, vector<8x8xf32> -> vector<8x8xf32>
    %c3_62 = arith.constant 3 : index
    %c0_63 = arith.constant 0 : index
    %c0_64 = arith.constant 0 : index
    %86 = vector.load %arg6[%c3_62, %c0_63, %c0_64] : memref<4x32x8xf32, #tpu.memory_space<vmem>>, vector<1x32x8xf32>
    %87 = vector.shape_cast %86 : vector<1x32x8xf32> to vector<32x8xf32>
    %cst_65 = arith.constant dense<0.000000e+00> : vector<16x8xf32>
    %88 = tpu.matmul %3, %87, %cst_65 {dimension_numbers = #tpu.dot_dimension_numbers<[1], [0], [0], [1], [0, 0, 1, 1], [], []>} : vector<16x32xf32>, vector<32x8xf32>, vector<16x8xf32> -> vector<16x8xf32>
    %c3_66 = arith.constant 3 : index
    %c0_67 = arith.constant 0 : index
    %c0_68 = arith.constant 0 : index
    %89 = vector.load %arg7[%c3_66, %c0_67, %c0_68] : memref<4x32x8xf32, #tpu.memory_space<vmem>>, vector<1x32x8xf32>
    %90 = vector.shape_cast %89 : vector<1x32x8xf32> to vector<32x8xf32>
    %cst_69 = arith.constant dense<0.000000e+00> : vector<16x8xf32>
    %91 = tpu.matmul %3, %90, %cst_69 {dimension_numbers = #tpu.dot_dimension_numbers<[1], [0], [0], [1], [0, 0, 1, 1], [], []>} : vector<16x32xf32>, vector<32x8xf32>, vector<16x8xf32> -> vector<16x8xf32>
    %cst_70 = arith.constant dense<0.000000e+00> : vector<8x16xf32>
    %92 = tpu.matmul %85, %88, %cst_70 {dimension_numbers = #tpu.dot_dimension_numbers<[1], [1], [0], [0], [0, 0, 1, 0], [], []>} : vector<8x8xf32>, vector<16x8xf32>, vector<8x16xf32> -> vector<8x16xf32>
    %cst_71 = arith.constant dense<0xFF800000> : vector<8xf32>
    %93 = vector.multi_reduction <maximumf>, %92, %cst_71 [1] : vector<8x16xf32> to vector<8xf32>
    %94 = vector.shape_cast %93 : vector<8xf32> to vector<8x1xf32>
    %95 = vector.broadcast %94 : vector<8x1xf32> to vector<8x16xf32>
    %96 = arith.subf %92, %95 : vector<8x16xf32>
    %97 = math.exp %96 : vector<8x16xf32>
    %cst_72 = arith.constant dense<0.000000e+00> : vector<8xf32>
    %98 = vector.multi_reduction <add>, %97, %cst_72 [1] : vector<8x16xf32> to vector<8xf32>
    %99 = vector.shape_cast %98 : vector<8xf32> to vector<8x1xf32>
    %100 = tpu.reciprocal %99 : vector<8x1xf32> -> vector<8x1xf32>
    %101 = vector.broadcast %100 : vector<8x1xf32> to vector<8x16xf32>
    %102 = arith.mulf %97, %101 : vector<8x16xf32>
    %cst_73 = arith.constant dense<0.000000e+00> : vector<8x8xf32>
    %103 = tpu.matmul %102, %91, %cst_73 {dimension_numbers = #tpu.dot_dimension_numbers<[1], [0], [0], [1], [0, 0, 1, 1], [], []>} : vector<8x16xf32>, vector<16x8xf32>, vector<8x8xf32> -> vector<8x8xf32>
    %c0_74 = arith.constant 0 : index
    %c24 = arith.constant 24 : index
    %104 = vector.load %arg10[%c0_74, %c24] : memref<8x32xf32, #tpu.memory_space<vmem>>, vector<8x8xf32>
    tpu.vector_store %arg10[%c0_74, %c24], %103 {strides = array<i32>} : memref<8x32xf32, #tpu.memory_space<vmem>>, vector<8x8xf32>,
    %c0_75 = arith.constant 0 : index
    %c0_76 = arith.constant 0 : index
    %105 = vector.load %arg10[%c0_75, %c0_76] : memref<8x32xf32, #tpu.memory_space<vmem>>, vector<8x32xf32>
    %c0_77 = arith.constant 0 : index
    %c0_78 = arith.constant 0 : index
    %106 = vector.load %arg8[%c0_77, %c0_78] : memref<32x32xf32, #tpu.memory_space<vmem>>, vector<32x32xf32>
    %cst_79 = arith.constant dense<0.000000e+00> : vector<8x32xf32>
    %107 = tpu.matmul %105, %106, %cst_79 {dimension_numbers = #tpu.dot_dimension_numbers<[1], [0], [0], [1], [0, 0, 1, 1], [], []>} : vector<8x32xf32>, vector<32x32xf32>, vector<8x32xf32> -> vector<8x32xf32>
    %108 = arith.addf %1, %107 : vector<8x32xf32>
    %c0_80 = arith.constant 0 : index
    %c0_81 = arith.constant 0 : index
    %c0_82 = arith.constant 0 : index
    %109 = vector.load %arg9[%c0_80, %c0_81, %c0_82] : memref<1x8x32xf32, #tpu.memory_space<vmem>>, vector<1x8x32xf32>
    %110 = vector.shape_cast %109 : vector<1x8x32xf32> to vector<8x32xf32>
    %111 = vector.shape_cast %108 : vector<8x32xf32> to vector<1x8x32xf32>
    tpu.vector_store %arg9[%c0_80, %c0_81, %c0_82], %111 {strides = array<i32>} : memref<1x8x32xf32, #tpu.memory_space<vmem>>, vector<1x8x32xf32>,
    return
  }
  func.func @transform_0(%arg0: i32, %arg1: i32) -> (i32, i32, i32) {
    %c0_i32 = arith.constant 0 : i32
    %c0_i32_0 = arith.constant 0 : i32
    return %arg0, %arg1, %c0_i32 : i32, i32, i32
  }
  func.func @transform_1(%arg0: i32, %arg1: i32) -> (i32, i32, i32) {
    %c0_i32 = arith.constant 0 : i32
    %c0_i32_0 = arith.constant 0 : i32
    %c0_i32_1 = arith.constant 0 : i32
    return %arg0, %c0_i32, %c0_i32_0 : i32, i32, i32
  }
  func.func @transform_2(%arg0: i32, %arg1: i32) -> (i32, i32) {
    %c0_i32 = arith.constant 0 : i32
    %c0_i32_0 = arith.constant 0 : i32
    %c0_i32_1 = arith.constant 0 : i32
    return %c0_i32, %c0_i32_0 : i32, i32
  }
  func.func @transform_3(%arg0: i32, %arg1: i32) -> (i32, i32, i32) {
    %c0_i32 = arith.constant 0 : i32
    %c0_i32_0 = arith.constant 0 : i32
    %c0_i32_1 = arith.constant 0 : i32
    %c0_i32_2 = arith.constant 0 : i32
    return %c0_i32, %c0_i32_0, %c0_i32_1 : i32, i32, i32
  }
  func.func @transform_4(%arg0: i32, %arg1: i32) -> (i32, i32, i32) {
    %c0_i32 = arith.constant 0 : i32
    %c0_i32_0 = arith.constant 0 : i32
    %c0_i32_1 = arith.constant 0 : i32
    %c0_i32_2 = arith.constant 0 : i32
    return %c0_i32, %c0_i32_0, %c0_i32_1 : i32, i32, i32
  }
  func.func @transform_5(%arg0: i32, %arg1: i32) -> (i32, i32, i32) {
    %c0_i32 = arith.constant 0 : i32
    %c0_i32_0 = arith.constant 0 : i32
    %c0_i32_1 = arith.constant 0 : i32
    %c0_i32_2 = arith.constant 0 : i32
    return %c0_i32, %c0_i32_0, %c0_i32_1 : i32, i32, i32
  }
  func.func @transform_6(%arg0: i32, %arg1: i32) -> (i32, i32) {
    %c0_i32 = arith.constant 0 : i32
    %c0_i32_0 = arith.constant 0 : i32
    %c0_i32_1 = arith.constant 0 : i32
    return %c0_i32, %c0_i32_0 : i32, i32
  }
  func.func @transform_7(%arg0: i32, %arg1: i32) -> (i32, i32, i32) {
    %c0_i32 = arith.constant 0 : i32
    %c0_i32_0 = arith.constant 0 : i32
    return %arg0, %arg1, %c0_i32 : i32, i32, i32
  }
}

</mosaic_0001>

<bundles_post_ra>
// kernel: tpu_custom_call.1
= control target key start
LH: loop header
LB: loop body
LE: loop exit
PB: predicated region body
PF: predicated region fallthrough
CT: control target
= control target key end

     0   :  { %12 = vsyncpa [#allocation4], 0  ;;  %s3135_s0 = inlined_call_operand.vmem [shape: f32[2,8,32], index: 0, kind: input, shape index: {}]   ;;  %s3136_s1 = inlined_call_operand.vmem [shape: f32[2,16,32], index: 1, kind: input, shape index: {}]   ;;  %s3137_s2 = inlined_call_operand.vmem [shape: f32[1,32], index: 2, kind: input, shape index: {}]   ;;  %s3138_s3 = inlined_call_operand.vmem [shape: f32[4,32,8], index: 3, kind: input, shape index: {}]   ;;  %s3139_s4 = inlined_call_operand.vmem [shape: f32[4,32,8], index: 4, kind: input, shape index: {}]   ;;  %s3140_s5 = inlined_call_operand.vmem [shape: f32[4,32,8], index: 5, kind: input, shape index: {}]   ;;  %s3141_s6 = inlined_call_operand.vmem [shape: f32[32,32], index: 6, kind: input, shape index: {}]   ;;  %s3142_s7 = inlined_call_operand.hbm [shape: f32[2,8,32], index: 7, kind: output, shape index: {}]  }
   0x1   :  { %14 = vsyncpa [#allocation4 + $0x1], 0  ;;  %s2723_s24 = smov 0   ;;  %s2725_s25 = smov 0  }
   0x2   :  { %s2727_s26 = smov 0   ;;  %s2729_s27 = smov 0  }
   0x3   :  { %s2731_s28 = smov 0   ;;  %s2733_s29 = smov 0  }
   0x4 LB: > { %s2137_s30 = sadd.s32 4294967295, %s2675_s29   ;;  %s2138_s8 = sadd.s32 4294967294, %s2675_s29   ;;  %s2675_s29 = sphi %s2733_s29, %s20_s29   ;;  %s2671_s28 = sphi %s2731_s28, %s3149_s28   ;;  %s2667_s27 = sphi %s2729_s27, %s3148_s27   ;;  %s2663_s26 = sphi %s2727_s26, %s3147_s26   ;;  %s2659_s25 = sphi %s2725_s25, %s3146_s25   ;;  %s2655_s24 = sphi %s2723_s24, %s3145_s24  }
   0x5   : > { %s32_s9 = sadd.s32 1, %s2671_s28  ;;  %s200_s10 = sadd.s32 1, %s2663_s26 }
   0x6   : > { %p34_p0 = scmp.ge.s32.totalorder %s32_s9, 2  ;;  %p210_p1 = scmp.ne.s32.totalorder %s2663_s26, %s2659_s25 }
   0x7   : > { %p211_p2 = scmp.eq.s32.totalorder %s2137_s30, 1  ;;  %p216_p3 = scmp.ne.s32.totalorder %s2659_s25, %s2655_s24 }
   0x8   : > { %s3151_s9 = smov (%p34_p0, %s32_s9), 0  ;;  %p217_p5 = scmp.eq.s32.totalorder %s2138_s8, 1 }
   0x9   : > { %p2763_p4 = por %p211_p2, %p210_p1  ;;  %s195_s12 = ssub.s32 %s2671_s28, %s3151_s9 }
   0xa   : > { %p2141_p6 = scmp.ge.s32.totalorder %s2675_s29, 1  ;;  %p198_p7 = scmp.eq.s32.totalorder %s195_s12, 0 }
   0xb   : > { %p2770_p8 = por %p217_p5, %p216_p3  ;;  %p268_p9 = scmp.lt.s32.totalorder %s2675_s29, 3 }
   0xc   : > { %s2776_s14 = scalar_select %p198_p7, %s2663_s26, %s200_s10  }
   0xd   : > { %p269_p10 = pnand %p2141_p6, %p268_p9 }
   0xe   : > { %p307_p11 = scmp.lt.s32.totalorder (!%p269_p10), %s2667_s27, 1  ;;  %s2679_s18 = smov (!%p269_p10), 8  }
   0xf   : > { %272 = sbr.rel (%p269_p10) target bundleno = 3542 (0xdd6), region = 48  ;;  %s2680_s19 = smov (!%p269_p10), 16  }
  0x14   : > { %s308_s15 = scalar_select %p307_p11, %s2667_s27, 1  ;;  %vm323_vm0 = vcmask 261120   ;;  %v420_v4 = vld [vmem:[%s3139_s4 + $0x18] sm:$0xff]  ;;  %v419_v5 = vld [vmem:[%s3139_s4 + $0x10] sm:$0xff]  ;;  %v418_v6 = vld [vmem:[%s3139_s4 + $0x8] sm:$0xff]  ;;  %v2677_v7 = vmov 0.0  }
  0x15   : > { %2333 = vmatprep.subr.mxu1 %v420_v4  ;;  %2322 = vmatprep.subr.mxu0 %v2677_v7  ;;  %v343_v8 = vld [vmem:[%s3138_s3 + $0x18] sm:$0xff]  ;;  %v342_v9 = vld [vmem:[%s3138_s3 + $0x10] sm:$0xff]  ;;  %v417_v10 = vld [vmem:[%s3139_s4] sm:$0xff]  ;;  %vm2678_vm1 = vmmov 0   ;;  %vm581_vm2 = vcmask 64512   ;;  %vm661_vm3 = vcmask 130048  }
  0x16   : > { %s2143_s16 = sshll.u32 %s308_s15, 3  ;;  %s2224_s17 = sshll.u32 %s308_s15, 4  ;;  %2334 = vmatpush3.msra.mxu1 %v420_v4  ;;  %2323 = vmatpush3.msra.mxu0 %v343_v8  ;;  %v341_v11 = vld [vmem:[%s3138_s3 + $0x8] sm:$0xff]  ;;  %v340_v13 = vld [vmem:[%s3138_s3] sm:$0xff]  ;;  %v505_v25 = vld [vmem:[%s3140_s5 + $0x18] sm:$0xff]  ;;  %vm1149_vm4 = vcmask 130112  }
  0x17   : > { %s313_s20 = scalar_lea.vmem %s3135_s0, %s2143_s16  ;;  %s318_s23 = scalar_lea.vmem %s3136_s1, %s2224_s17  ;;  %2335 = vmatprep.subr.mxu1 %v419_v5  ;;  %2324 = vmatprep.subr.mxu0 %v2677_v7  ;;  %v2146_v18 = vld [vmem:[%s3137_s2] ss:$0 sm:$0xff]  ;;  %v504_v26 = vld [vmem:[%s3140_s5 + $0x10] sm:$0xff]  ;;  %v503_v27 = vld [vmem:[%s3140_s5 + $0x8] sm:$0xff]  ;;  %vm1553_vm5 = vcmask 195712   ;;  %vm1957_vm6 = vcmask 261312  }
  0x18   : > { %v2786_v0 = vld [vmem:[%s313_s20] sm:$0xff]  ;;  %2336 = vmatpush3.msra.mxu1 %v419_v5  ;;  %v2818_v12 = vld [vmem:[%s318_s23 + $0x8] sm:$0xff]  ;;  %2325 = vmatpush3.msra.mxu0 %v342_v9  ;;  %v2164_v37 = vld [vmem:[%s3139_s4 + $0x38] sm:$0xff]  ;;  %s2681_s15 = smov 24   ;;  %s304_s16 = sand.u32 1, %s2659_s25  }
  0x19   : > { %v2788_v1 = vld [vmem:[%s318_s23] sm:$0xff]  ;;  %v322_v2 = vmul.f32 %v2786_v0, %v2786_v0  ;;  %2337 = vmatprep.subr.mxu1 %v418_v6  ;;  %2326 = vmatprep.subr.mxu0 %v2677_v7  ;;  %v2163_v38 = vld [vmem:[%s3139_s4 + $0x30] sm:$0xff]  ;;  %v2162_v40 = vld [vmem:[%s3139_s4 + $0x28] sm:$0xff]  ;;  %s2142_s17 = sshll.u32 %s304_s16, 3  ;;  %s2040_s8 = scalar_lea.sflag [#allocation4], %s304_s16 }
  0x1a   : > { %2341 = vmatprep.mubr.msk.f32.mxu1 %vm323_vm0, %v2788_v1  ;;  %2338 = vmatpush3.msra.mxu1 %v418_v6  ;;  %v502_v28 = vld [vmem:[%s3140_s5] sm:$0xff]  ;;  %v2159_v46 = vld [vmem:[%s3138_s3 + $0x38] sm:$0xff]  ;;  %v2158_v47 = vld [vmem:[%s3138_s3 + $0x30] sm:$0xff] }
  0x1b   : > { %v324_v3 = vsel %vm323_vm0, %v322_v2, 0.0  ;;  %2339 = vmatprep.subr.mxu1 %v417_v10  ;;  %2327 = vmatpush3.msra.mxu0 %v341_v11  ;;  %v2161_v42 = vld [vmem:[%s3139_s4 + $0x20] sm:$0xff]  ;;  %v2157_v48 = vld [vmem:[%s3138_s3 + $0x28] sm:$0xff]  ;;  %v2180_v54 = vld [vmem:[%s3138_s3 + $0x58] sm:$0xff] }
  0x1c   : > { %325 = vadd.xlane.f32.xlu0 %v324_v3  ;;  %2340 = vmatpush3.msra.mxu1 %v417_v10  ;;  %v2156_v49 = vld [vmem:[%s3138_s3 + $0x20] sm:$0xff]  ;;  %v2179_v56 = vld [vmem:[%s3138_s3 + $0x50] sm:$0xff]  ;;  %v2178_v58 = vld [vmem:[%s3138_s3 + $0x48] sm:$0xff] }
  0x1d   : > { %2342 = vmatmul.mubr.msk.f32.vlgmr.msra.gmra.mxu1 %vm323_vm0, %v2818_v12  ;;  %2328 = vmatprep.subr.mxu0 %v2677_v7  ;;  %v2177_v59 = vld [vmem:[%s3138_s3 + $0x40] sm:$0xff]  ;;  %v2170_v60 = vld [vmem:[%s3140_s5 + $0x38] sm:$0xff]  ;;  %v2169_v61 = vld [vmem:[%s3140_s5 + $0x30] sm:$0xff] }
  0x1e   : > { %2329 = vmatpush3.msra.mxu0 %v340_v13  ;;  %2330 = vmatprep.mubr.msk.f32.mxu0 %vm2678_vm1, %v2677_v7  ;;  %v2168_v62 = vld [vmem:[%s3140_s5 + $0x28] sm:$0xff]  ;;  %v2167_v63 = vld [vmem:[%s3140_s5 + $0x20] sm:$0xff] }
  0x1f   : > { %2355 = vmatprep.subr.mxu1 %v2677_v7  ;;  %2359 = vmatprep.mubr.msk.f32.mxu1 %vm2678_vm1, %v2677_v7 }
  0x20   : > { %2344 = vmatprep.subr.mxu0 %v505_v25 }
  0xa5   : > { %v326_v14 = vpop.xlane.xlu0 %325 }
  0xa6   : > { %v328_v15 = vmul.f32 0.03125, %v326_v14 }
  0xa8   : > { %v329_v16 = vadd.f32 1e-06, %v328_v15  ;;  %v2185_v15 = vld [vmem:[%s3139_s4 + $0x58] sm:$0xff] }
  0xaa   : > { %2581 = vrsqrt.f32 %v329_v16 }
  0xb7   : > { %v2582_v17 = vpop.eup %2581 }
  0xb8   : > { %v331_v19 = vmul.f32 %v2582_v17, %v2786_v0 }
  0xba   : > { %v2836_v20 = vmul.f32 %v2146_v18, %v331_v19 }
  0xbc   : > { %2331 = vmatmul.mubr.msk.f32.vlgmr.msra.gmra.mxu0 %vm323_vm0, %v2836_v20 }
  0xbd   : > { %2352 = vmatprep.mubr.msk.f32.mxu0 %vm323_vm0, %v2788_v1  ;;  %2345 = vmatpush3.msra.mxu0 %v505_v25 }
  0xbe   : > { %2346 = vmatprep.subr.mxu0 %v504_v26 }
  0xbf   : > { %2347 = vmatpush3.msra.mxu0 %v504_v26 }
  0xc0   : > { %2348 = vmatprep.subr.mxu0 %v503_v27 }
  0xc1   : > { %2349 = vmatpush3.msra.mxu0 %v503_v27 }
  0xc2   : > { %2350 = vmatprep.subr.mxu0 %v502_v28 }
  0xc3   : > { %2351 = vmatpush3.msra.mxu0 %v502_v28  ;;  %v2201_v28 = vld [vmem:[%s3138_s3 + $0x78] sm:$0xff] }
  0xc4   : > { %2353 = vmatmul.mubr.msk.f32.vlgmr.msra.gmra.mxu0 %vm323_vm0, %v2818_v12  ;;  %2380 = vmatprep.subr.mxu0 %v2164_v37 }
  0xc5   : > { %2388 = vmatprep.mubr.msk.f32.mxu0 %vm323_vm0, %v2788_v1  ;;  %2381 = vmatpush3.msra.mxu0 %v2164_v37 }
  0xc6   : > { %2382 = vmatprep.subr.mxu0 %v2163_v38 }
  0xc7   : > { %2383 = vmatpush3.msra.mxu0 %v2163_v38 }
  0xc8   : > { %2384 = vmatprep.subr.mxu0 %v2162_v40 }
  0xc9   : > { %2385 = vmatpush3.msra.mxu0 %v2162_v40 }
  0xca   : > { %2386 = vmatprep.subr.mxu0 %v2161_v42 }
  0xcb   : > { %2387 = vmatpush3.msra.mxu0 %v2161_v42 }
  0xcc   : > { %2389 = vmatmul.mubr.msk.f32.vlgmr.msra.gmra.mxu0 %vm323_vm0, %v2818_v12  ;;  %2402 = vmatprep.subr.mxu0 %v2677_v7 }
  0xcd   : > { %2406 = vmatprep.mubr.msk.f32.mxu0 %vm2678_vm1, %v2677_v7 }
  0xdd   : > { %v2343_v21 = vpop.f32.mrf.mxu1 }
  0xde   : > { %2356 = vmatpush3.xpose.msk.msra.mxu1 %vm581_vm2, %v2343_v21  ;;  %v2184_v21 = vld [vmem:[%s3139_s4 + $0x50] sm:$0xff] }
  0xdf   : > { %v493_v22 = vpop.f32.mrf.mxu1  ;;  %2357 = vmatprep.subr.mxu1 %v2677_v7 }
  0xe2   : > { %2358 = vmatpush3.xpose.msk.msra.mxu1 %vm581_vm2, %v493_v22  ;;  %v2183_v22 = vld [vmem:[%s3139_s4 + $0x48] sm:$0xff] }
  0xe3   : > { %2362 = vmatprep.subr.mxu1 %v2677_v7 }
 0x17c   : > { %v413_v23 = vpop.f32.mrf.mxu0 }
 0x17d   : > { %2360 = vmatmul.mubr.msk.f32.vlgmr.msra.gmra.mxu1 %vm581_vm2, %v413_v23  ;;  %v2182_v23 = vld [vmem:[%s3139_s4 + $0x40] sm:$0xff] }
 0x17e   : > { %v2332_v24 = vpop.f32.mrf.mxu0  ;;  %2366 = vmatprep.mubr.msk.f32.mxu1 %vm2678_vm1, %v2677_v7 }
 0x184   : > { %v2354_v39 = vpop.f32.mrf.mxu0 }
 0x185   : > { %2363 = vmatpush3.msra.mxu1 %v2354_v39 }
 0x186   : > { %v572_v41 = vpop.f32.mrf.mxu0  ;;  %2364 = vmatprep.subr.mxu1 %v2677_v7 }
 0x187   : > { %2365 = vmatpush3.msra.mxu1 %v572_v41 }
 0x188   : > { %2369 = vmatprep.subr.mxu1 %v2677_v7 }
 0x18c   : > { %v2390_v50 = vpop.f32.mrf.mxu0 }
 0x18d   : > { %2403 = vmatpush3.xpose.msk.msra.mxu0 %vm581_vm2, %v2390_v50 }
 0x18e   : > { %2404 = vmatprep.subr.mxu0 %v2677_v7  ;;  %v893_v51 = vpop.f32.mrf.mxu0 }
 0x191   : > { %2405 = vmatpush3.xpose.msk.msra.mxu0 %vm581_vm2, %v893_v51  ;;  %v2205_v51 = vld [vmem:[%s3139_s4 + $0x70] sm:$0xff] }
 0x192   : > { %2416 = vmatprep.subr.mxu0 %v2677_v7 }
 0x23d   : > { %v657_v29 = vpop.f32.mrf.mxu1 }
 0x23e   : > { %v662_v30 = vsel %vm661_vm3, %v657_v29, -inf }
 0x23f   : > { %663 = vmax.xlane.f32.xlu0 %v662_v30  ;;  %v2361_v31 = vpop.f32.mrf.mxu1  ;;  %v2199_v30 = vld [vmem:[%s3138_s3 + $0x68] sm:$0xff] }
 0x240   : > { %v2198_v31 = vld [vmem:[%s3138_s3 + $0x60] sm:$0xff] }
 0x2c8   : > { %v664_v32 = vpop.xlane.xlu0 %663 }
 0x2c9   : > { %v665_v33 = vsub.f32 %v657_v29, %v664_v32  ;;  %v2200_v29 = vld [vmem:[%s3138_s3 + $0x70] sm:$0xff]  ;;  %v2191_v32 = vld [vmem:[%s3140_s5 + $0x58] sm:$0xff] }
 0x2cb   : > { %v666_v34 = vmul.f32 1.442695, %v665_v33  ;;  %v2190_v33 = vld [vmem:[%s3140_s5 + $0x50] sm:$0xff] }
 0x2cd   : > { %2583 = vpow2.f32 %v666_v34  ;;  %v2189_v34 = vld [vmem:[%s3140_s5 + $0x48] sm:$0xff] }
 0x2da   : > { %v2584_v35 = vpop.eup %2583 }
 0x2db   : > { %v668_v36 = vsel %vm661_vm3, %v2584_v35, 0.0 }
 0x2dc   : > { %669 = vadd.xlane.f32.xlu1 %v668_v36 }
 0x365   : > { %v670_v43 = vpop.xlane.xlu1 %669 }
 0x366   : > { %2585 = vrcp.f32 %v670_v43 }
 0x373   : > { %v2586_v44 = vpop.eup %2585 }
 0x374   : > { %v672_v45 = vmul.f32 %v2586_v44, %v2584_v35 }
 0x376   : > { %2367 = vmatmul.mubr.msk.f32.vlgmr.msra.gmra.mxu1 %vm661_vm3, %v672_v45 }
 0x377   : > { %2370 = vmatpush3.msra.mxu1 %v2159_v46  ;;  %2377 = vmatprep.mubr.msk.f32.mxu1 %vm2678_vm1, %v2677_v7  ;;  %v2206_v46 = vld [vmem:[%s3139_s4 + $0x78] sm:$0xff] }
 0x378   : > { %2371 = vmatprep.subr.mxu1 %v2677_v7 }
 0x379   : > { %2372 = vmatpush3.msra.mxu1 %v2158_v47 }
 0x37a   : > { %2373 = vmatprep.subr.mxu1 %v2677_v7 }
 0x37b   : > { %2374 = vmatpush3.msra.mxu1 %v2157_v48 }
 0x37c   : > { %2375 = vmatprep.subr.mxu1 %v2677_v7 }
 0x37d   : > { %2376 = vmatpush3.msra.mxu1 %v2156_v49 }
 0x37e   : > { %2378 = vmatmul.mubr.msk.f32.vlgmr.msra.gmra.mxu1 %vm323_vm0, %v2836_v20  ;;  %2391 = vmatprep.subr.mxu1 %v2170_v60 }
 0x37f   : > { %2399 = vmatprep.mubr.msk.f32.mxu1 %vm323_vm0, %v2788_v1  ;;  %2392 = vmatpush3.msra.mxu1 %v2170_v60  ;;  %v2209_v60 = vld [vmem:[%s3140_s5 + $0x60] sm:$0xff] }
 0x380   : > { %2393 = vmatprep.subr.mxu1 %v2169_v61 }
 0x381   : > { %2394 = vmatpush3.msra.mxu1 %v2169_v61 }
 0x382   : > { %2395 = vmatprep.subr.mxu1 %v2168_v62 }
 0x383   : > { %2396 = vmatpush3.msra.mxu1 %v2168_v62 }
 0x384   : > { %2397 = vmatprep.subr.mxu1 %v2167_v63 }
 0x385   : > { %2398 = vmatpush3.msra.mxu1 %v2167_v63 }
 0x386   : > { %2400 = vmatmul.mubr.msk.f32.vlgmr.msra.gmra.mxu1 %vm323_vm0, %v2818_v12  ;;  %2409 = vmatprep.subr.mxu1 %v2677_v7 }
 0x387   : > { %2413 = vmatprep.mubr.msk.f32.mxu1 %vm2678_vm1, %v2677_v7 }
 0x436   : > { %v742_v52 = vpop.f32.mrf.mxu1 }
 0x437   : > { %746 = vst.msk [vmem:[#allocation2] sm:$0xff] %vm581_vm2, %v742_v52  ;;  %v2204_v52 = vld [vmem:[%s3139_s4 + $0x68] sm:$0xff] }
 0x438   : > { %v2368_v53 = vpop.f32.mrf.mxu1 }
 0x439   : > { %v2203_v53 = vld [vmem:[%s3139_s4 + $0x60] sm:$0xff] }
 0x43e   : > { %v818_v55 = vpop.f32.mrf.mxu1 }
 0x43f   : > { %2407 = vmatmul.mubr.msk.f32.vlgmr.msra.gmra.mxu0 %vm581_vm2, %v818_v55 }
 0x440   : > { %2417 = vmatpush3.msra.mxu0 %v2180_v54  ;;  %v2379_v57 = vpop.f32.mrf.mxu1  ;;  %2424 = vmatprep.mubr.msk.f32.mxu0 %vm2678_vm1, %v2677_v7 }
 0x441   : > { %2418 = vmatprep.subr.mxu0 %v2677_v7  ;;  %v2212_v57 = vld [vmem:[%s3140_s5 + $0x78] sm:$0xff] }
 0x442   : > { %2419 = vmatpush3.msra.mxu0 %v2179_v56 }
 0x443   : > { %2420 = vmatprep.subr.mxu0 %v2677_v7 }
 0x444   : > { %2421 = vmatpush3.msra.mxu0 %v2178_v58  ;;  %v2211_v58 = vld [vmem:[%s3140_s5 + $0x70] sm:$0xff] }
 0x445   : > { %2422 = vmatprep.subr.mxu0 %v2677_v7 }
 0x446   : > { %2423 = vmatpush3.msra.mxu0 %v2177_v59  ;;  %v2401_v14 = vpop.f32.mrf.mxu1  ;;  %v2210_v59 = vld [vmem:[%s3140_s5 + $0x68] sm:$0xff] }
 0x447   : > { %2425 = vmatmul.mubr.msk.f32.vlgmr.msra.gmra.mxu0 %vm323_vm0, %v2836_v20  ;;  %2410 = vmatpush3.msra.mxu1 %v2401_v14 }
 0x448   : > { %2446 = vmatprep.mubr.msk.f32.mxu0 %vm323_vm0, %v2788_v1  ;;  %v973_v16 = vpop.f32.mrf.mxu1  ;;  %2411 = vmatprep.subr.mxu1 %v2677_v7 }
 0x449   : > { %2412 = vmatpush3.msra.mxu1 %v973_v16  ;;  %2438 = vmatprep.subr.mxu0 %v2191_v32  ;;  %v1962_v16 = vld [vmem:[%s3141_s6 + $0x10] sm:$0xff] }
 0x44a   : > { %2427 = vmatprep.subr.mxu1 %v2185_v15  ;;  %2439 = vmatpush3.msra.mxu0 %v2191_v32 }
 0x44b   : > { %2440 = vmatprep.subr.mxu0 %v2190_v33 }
 0x44c   : > { %2441 = vmatpush3.msra.mxu0 %v2190_v33 }
 0x44d   : > { %2442 = vmatprep.subr.mxu0 %v2189_v34 }
 0x44e   : > { %2443 = vmatpush3.msra.mxu0 %v2189_v34 }
 0x4ff   : > { %v1057_v2 = vpop.f32.mrf.mxu0 }
 0x500   : > { %v1061_v3 = vsel %vm661_vm3, %v1057_v2, -inf }
 0x501   : > { %1062 = vmax.xlane.f32.xlu1 %v1061_v3  ;;  %v2408_v4 = vpop.f32.mrf.mxu0 }
 0x507   : > { %v1222_v5 = vpop.f32.mrf.mxu0 }
 0x509   : > { %v2426_v6 = vpop.f32.mrf.mxu0 }
 0x58a   : > { %v1063_v8 = vpop.xlane.xlu1 %1062 }
 0x58b   : > { %v1064_v9 = vsub.f32 %v1057_v2, %v1063_v8 }
 0x58d   : > { %v1065_v10 = vmul.f32 1.442695, %v1064_v9 }
 0x58f   : > { %2587 = vpow2.f32 %v1065_v10 }
 0x59c   : > { %v2588_v11 = vpop.eup %2587 }
 0x59d   : > { %v1067_v13 = vsel %vm661_vm3, %v2588_v11, 0.0 }
 0x59e   : > { %1068 = vadd.xlane.f32.xlu0 %v1067_v13 }
 0x627   : > { %v1069_v17 = vpop.xlane.xlu0 %1068 }
 0x628   : > { %2589 = vrcp.f32 %v1069_v17  ;;  %v1961_v17 = vld [vmem:[%s3141_s6 + $0x8] sm:$0xff] }
 0x635   : > { %v2590_v18 = vpop.eup %2589 }
 0x636   : > { %v1071_v19 = vmul.f32 %v2590_v18, %v2588_v11  ;;  %v1960_v18 = vld [vmem:[%s3141_s6] sm:$0xff] }
 0x638   : > { %2414 = vmatmul.mubr.msk.f32.vlgmr.msra.gmra.mxu1 %vm661_vm3, %v1071_v19 }
 0x639   : > { %2428 = vmatpush3.msra.mxu1 %v2185_v15  ;;  %2435 = vmatprep.mubr.msk.f32.mxu1 %vm323_vm0, %v2788_v1  ;;  %v1963_v15 = vld [vmem:[%s3141_s6 + $0x18] sm:$0xff] }
 0x63a   : > { %2429 = vmatprep.subr.mxu1 %v2184_v21 }
 0x63b   : > { %2430 = vmatpush3.msra.mxu1 %v2184_v21 }
 0x63c   : > { %2431 = vmatprep.subr.mxu1 %v2183_v22 }
 0x63d   : > { %2432 = vmatpush3.msra.mxu1 %v2183_v22 }
 0x63e   : > { %2433 = vmatprep.subr.mxu1 %v2182_v23 }
 0x63f   : > { %2434 = vmatpush3.msra.mxu1 %v2182_v23 }
 0x640   : > { %2436 = vmatmul.mubr.msk.f32.vlgmr.msra.gmra.mxu1 %vm323_vm0, %v2818_v12  ;;  %2449 = vmatprep.subr.mxu1 %v2677_v7 }
 0x641   : > { %2453 = vmatprep.mubr.msk.f32.mxu1 %vm2678_vm1, %v2677_v7 }
 0x6f8   : > { %v2975_v24 = vpop.f32.mrf.mxu1 }
 0x6fa   : > { %v2415_v25 = vpop.f32.mrf.mxu1 }
 0x700   : > { %v2437_v26 = vpop.f32.mrf.mxu1 }
 0x701   : > { %2450 = vmatpush3.xpose.msk.msra.mxu1 %vm581_vm2, %v2437_v26 }
 0x702   : > { %2451 = vmatprep.subr.mxu1 %v2677_v7  ;;  %v1297_v27 = vpop.f32.mrf.mxu1 }
 0x705   : > { %2452 = vmatpush3.xpose.msk.msra.mxu1 %vm581_vm2, %v1297_v27 }
 0x706   : > { %2463 = vmatprep.subr.mxu1 %v2677_v7 }
 0x708   : > { %2454 = vmatmul.mubr.msk.f32.vlgmr.msra.gmra.mxu1 %vm581_vm2, %v1222_v5 }
 0x709   : > { %2464 = vmatpush3.msra.mxu1 %v2201_v28  ;;  %2471 = vmatprep.mubr.msk.f32.mxu1 %vm2678_vm1, %v2677_v7 }
 0x70a   : > { %2465 = vmatprep.subr.mxu1 %v2677_v7 }
 0x70b   : > { %2466 = vmatpush3.msra.mxu1 %v2200_v29 }
 0x70c   : > { %2467 = vmatprep.subr.mxu1 %v2677_v7 }
 0x70d   : > { %2468 = vmatpush3.msra.mxu1 %v2199_v30 }
 0x70e   : > { %2469 = vmatprep.subr.mxu1 %v2677_v7 }
 0x70f   : > { %2470 = vmatpush3.msra.mxu1 %v2198_v31 }
 0x710   : > { %2472 = vmatmul.mubr.msk.f32.vlgmr.msra.gmra.mxu1 %vm323_vm0, %v2836_v20  ;;  %v2188_v20 = vld [vmem:[%s3140_s5 + $0x40] sm:$0xff]  ;;  %2485 = vmatprep.subr.mxu1 %v2212_v57 }
 0x711   : > { %2493 = vmatprep.mubr.msk.f32.mxu1 %vm323_vm0, %v2788_v1  ;;  %2444 = vmatprep.subr.mxu0 %v2188_v20 }
 0x712   : > { %2445 = vmatpush3.msra.mxu0 %v2188_v20  ;;  %2486 = vmatpush3.msra.mxu1 %v2212_v57 }
 0x713   : > { %2447 = vmatmul.mubr.msk.f32.vlgmr.msra.gmra.mxu0 %vm323_vm0, %v2818_v12  ;;  %2456 = vmatprep.subr.mxu0 %v2677_v7 }
 0x714   : > { %2460 = vmatprep.mubr.msk.f32.mxu0 %vm2678_vm1, %v2677_v7  ;;  %2487 = vmatprep.subr.mxu1 %v2211_v58 }
 0x715   : > { %2488 = vmatpush3.msra.mxu1 %v2211_v58 }
 0x716   : > { %2489 = vmatprep.subr.mxu1 %v2210_v59 }
 0x717   : > { %2490 = vmatpush3.msra.mxu1 %v2210_v59 }
 0x718   : > { %2491 = vmatprep.subr.mxu1 %v2209_v60 }
 0x719   : > { %2492 = vmatpush3.msra.mxu1 %v2209_v60 }
 0x71a   : > { %2494 = vmatmul.mubr.msk.f32.vlgmr.msra.gmra.mxu1 %vm323_vm0, %v2818_v12  ;;  %2503 = vmatprep.subr.mxu1 %v2677_v7 }
 0x71b   : > { %2507 = vmatprep.mubr.msk.f32.mxu1 %vm2678_vm1, %v2677_v7 }
 0x7c8   : > { %v1461_v35 = vpop.f32.mrf.mxu1 }
 0x7c9   : > { %v1465_v36 = vsel %vm661_vm3, %v1461_v35, -inf }
 0x7ca   : > { %1466 = vmax.xlane.f32.xlu1 %v1465_v36  ;;  %v2455_v37 = vpop.f32.mrf.mxu1 }
 0x7d0   : > { %v1626_v38 = vpop.f32.mrf.mxu1 }
 0x7d2   : > { %v2473_v39 = vpop.f32.mrf.mxu1 }
 0x7d3   : > { %v2448_v45 = vpop.f32.mrf.mxu0 }
 0x7d4   : > { %2457 = vmatpush3.msra.mxu0 %v2448_v45 }
 0x7d5   : > { %v1377_v47 = vpop.f32.mrf.mxu0  ;;  %2458 = vmatprep.subr.mxu0 %v2677_v7 }
 0x7d6   : > { %2459 = vmatpush3.msra.mxu0 %v1377_v47 }
 0x7d7   : > { %2474 = vmatprep.subr.mxu0 %v2206_v46 }
 0x7da   : > { %v2495_v8 = vpop.f32.mrf.mxu1 }
 0x7db   : > { %2504 = vmatpush3.msra.mxu1 %v2495_v8 }
 0x7dc   : > { %v1781_v9 = vpop.f32.mrf.mxu1  ;;  %2505 = vmatprep.subr.mxu1 %v2677_v7 }
 0x7dd   : > { %2506 = vmatpush3.msra.mxu1 %v1781_v9 }
 0x853   : > { %v1467_v40 = vpop.xlane.xlu1 %1466 }
 0x854   : > { %v1468_v41 = vsub.f32 %v1461_v35, %v1467_v40 }
 0x856   : > { %v1469_v42 = vmul.f32 1.442695, %v1468_v41 }
 0x858   : > { %2591 = vpow2.f32 %v1469_v42 }
 0x865   : > { %v2592_v43 = vpop.eup %2591 }
 0x866   : > { %v1471_v44 = vsel %vm661_vm3, %v2592_v43, 0.0 }
 0x867   : > { %1472 = vadd.xlane.f32.xlu0 %v1471_v44 }
 0x8f0   : > { %v1473_v48 = vpop.xlane.xlu0 %1472 }
 0x8f1   : > { %2593 = vrcp.f32 %v1473_v48 }
 0x8fe   : > { %v2594_v49 = vpop.eup %2593 }
 0x8ff   : > { %v1475_v50 = vmul.f32 %v2594_v49, %v2592_v43 }
 0x901   : > { %2461 = vmatmul.mubr.msk.f32.vlgmr.msra.gmra.mxu0 %vm661_vm3, %v1475_v50 }
 0x902   : > { %2475 = vmatpush3.msra.mxu0 %v2206_v46  ;;  %2482 = vmatprep.mubr.msk.f32.mxu0 %vm323_vm0, %v2788_v1 }
 0x903   : > { %2476 = vmatprep.subr.mxu0 %v2205_v51 }
 0x904   : > { %2477 = vmatpush3.msra.mxu0 %v2205_v51 }
 0x905   : > { %2478 = vmatprep.subr.mxu0 %v2204_v52 }
 0x906   : > { %2479 = vmatpush3.msra.mxu0 %v2204_v52 }
 0x907   : > { %2480 = vmatprep.subr.mxu0 %v2203_v53 }
 0x908   : > { %2481 = vmatpush3.msra.mxu0 %v2203_v53 }
 0x909   : > { %2483 = vmatmul.mubr.msk.f32.vlgmr.msra.gmra.mxu0 %vm323_vm0, %v2818_v12  ;;  %2496 = vmatprep.subr.mxu0 %v2677_v7 }
 0x90a   : > { %2500 = vmatprep.mubr.msk.f32.mxu0 %vm2678_vm1, %v2677_v7 }
 0x9c1   : > { %v1545_v54 = vpop.f32.mrf.mxu0 }
 0x9c3   : > { %v2462_v1 = vpop.f32.mrf.mxu0 }
 0x9c9   : > { %v2484_v55 = vpop.f32.mrf.mxu0 }
 0x9ca   : > { %2497 = vmatpush3.xpose.msk.msra.mxu0 %vm581_vm2, %v2484_v55 }
 0x9cb   : > { %2498 = vmatprep.subr.mxu0 %v2677_v7  ;;  %v1701_v56 = vpop.f32.mrf.mxu0 }
 0x9ce   : > { %2499 = vmatpush3.xpose.msk.msra.mxu0 %vm581_vm2, %v1701_v56 }
 0x9cf   : > { %2510 = vmatprep.subr.mxu0 %v2677_v7 }
 0x9d1   : > { %2501 = vmatmul.mubr.msk.f32.vlgmr.msra.gmra.mxu0 %vm581_vm2, %v1626_v38 }
 0x9d2   : > { %2518 = vmatprep.mubr.msk.f32.mxu0 %vm2678_vm1, %v2677_v7  ;;  %2511 = vmatpush3.msra.mxu0 %v1963_v15 }
 0x9d3   : > { %2512 = vmatprep.subr.mxu0 %v2677_v7 }
 0x9d4   : > { %2513 = vmatpush3.msra.mxu0 %v1962_v16 }
 0x9d5   : > { %2514 = vmatprep.subr.mxu0 %v2677_v7 }
 0x9d6   : > { %2515 = vmatpush3.msra.mxu0 %v1961_v17 }
 0x9d7   : > { %2516 = vmatprep.subr.mxu0 %v2677_v7 }
 0x9d8   : > { %2517 = vmatpush3.msra.mxu0 %v1960_v18 }
 0xa91   : > { %v1865_v61 = vpop.f32.mrf.mxu0 }
 0xa92   : > { %v1869_v62 = vsel %vm661_vm3, %v1865_v61, -inf }
 0xa93   : > { %1870 = vmax.xlane.f32.xlu1 %v1869_v62  ;;  %v2502_v63 = vpop.f32.mrf.mxu0 }
 0xaa4   : > { %1146 = vrot.lane.b32.xlu1 %v2975_v24, %s2679_s18  ;;  %s2221_s18 = sshll.u32 %s2667_s27, 7  ;;  %s2682_s27 = smov [#allocation3]  }
 0xaa5   : > { %s3094_s30 = scalar_lea.hbm %s3142_s7, %s2221_s18  ;;  %s2603_s12 = sshll.u32 %s2682_s27, 4  ;;  %s2604_s12 = int_to_ptr.vmem [resolvable:$false] %s2603_s12 }
 0xaa6   : > { %s2605_s23 = scalar_lea.vmem %s2604_s12, 256 }
 0xb1c   : > { %v1871_v2 = vpop.xlane.xlu1 %1870 }
 0xb1d   : > { %v1872_v3 = vsub.f32 %v1865_v61, %v1871_v2 }
 0xb1f   : > { %v1873_v4 = vmul.f32 1.442695, %v1872_v3 }
 0xb20   : > { %v1147_v5 = vpop.permute.xlu1 %1146 }
 0xb21   : > { %2595 = vpow2.f32 %v1873_v4  ;;  %1150 = vst.msk [vmem:[#allocation2] sm:$0xff] %vm1149_vm4, %v1147_v5 }
 0xb2e   : > { %v2596_v12 = vpop.eup %2595 }
 0xb2f   : > { %v1875_v6 = vsel %vm661_vm3, %v2596_v12, 0.0 }
 0xb30   : > { %1876 = vadd.xlane.f32.xlu0 %v1875_v6 }
 0xb46   : > { %1550 = vrot.lane.b32.xlu0 %v1545_v54, %s2680_s19  ;;  %s306_s19 = scalar_lea.vmem [#allocation3], %s2142_s17 }
 0xb47   : > { %s2054_s20 = sshll.u32 %s306_s19, 4  ;;  %s2055_s20 = int_to_ptr.vmem [resolvable:$true] %s2054_s20 }
 0xb48   : > { %s2599_s10 = scalar_lea.vmem %s2055_s20, 128  ;;  %p2606_p1 = scmp.lt.s32.totalorder %s2055_s20, %s2604_s12 }
 0xb49   : > { %p2600_p12 = scmp.ne.s32.totalorder %s2055_s20, %s2599_s10  ;;  %p2607_p2 = scmp.lt.s32.totalorder %s2605_s23, %s2599_s10 }
 0xb4b   : > { %p2601_p13 = pnand %p2600_p12, %p2763_p4  ;;  %p2608_p3 = por %p2607_p2, %p2606_p1 }
 0xb4d   : > { %p2602_p0 = pneg %p2601_p13 }
 0xb4f   : > { %p2609_p5 = pnand %p2608_p3, %p2602_p0 }
 0xbb9   : > { %v1877_v10 = vpop.xlane.xlu0 %1876 }
 0xbba   : > { %2597 = vrcp.f32 %v1877_v10 }
 0xbbd   : > { %v1551_v11 = vpop.permute.xlu0 %1550 }
 0xbbe   : > { %1554 = vst.msk [vmem:[#allocation2] sm:$0xff] %vm1553_vm5, %v1551_v11 }
 0xbc7   : > { %v2598_v13 = vpop.eup %2597 }
 0xbc8   : > { %v1879_v14 = vmul.f32 %v2598_v13, %v2596_v12 }
 0xbca   : > { %2508 = vmatmul.mubr.msk.f32.vlgmr.msra.gmra.mxu1 %vm661_vm3, %v1879_v14 }
 0xc8a   : > { %v1949_v19 = vpop.f32.mrf.mxu1 }
 0xc8b   : > { %1954 = vrot.lane.b32.xlu1 %v1949_v19, %s2681_s15 }
 0xc8c   : > { %v2509_v21 = vpop.f32.mrf.mxu1 }
 0xcfd   : > { %v1955_v22 = vpop.permute.xlu1 %1954 }
 0xcfe   : > { %1958 = vst.msk [vmem:[#allocation2] sm:$0xff] %vm1957_vm6, %v1955_v22 }
 0xd05   : > { %v1959_v23 = vld [vmem:[#allocation2] sm:$0xff] }
 0xd06   : > { %2519 = vmatmul.mubr.msk.f32.vlgmr.msra.gmra.mxu0 %vm323_vm0, %v1959_v23 }
 0xdc6   : > { %v2033_v24 = vpop.f32.mrf.mxu0 }
 0xdc7   : > { %v2037_v7 = vadd.f32 %v2033_v24, %v2786_v0 }
 0xdc8   : > { %v2520_v25 = vpop.f32.mrf.mxu0 }
 0xdc9   : > { %2038 = vst.msk [vmem:[%s306_s19] sm:$0xff] %vm323_vm0, %v2037_v7 }
 0xdca   : > { %2612 = shalt.err (!%p2609_p5)
}
 0xdcb   : > { %s2613_s15 = scalar_lea.hbm %s3094_s30, 128  ;;  %s2617_s18 = scalar_lea.hbm %s3142_s7, 256 }
 0xdcc   : > { %p2614_p6 = scmp.ne.s32.totalorder %s3094_s30, %s2613_s15  ;;  %p2618_p10 = scmp.lt.s32.totalorder %s3094_s30, %s3142_s7 }
 0xdcd   : > { %p2619_p11 = scmp.lt.s32.totalorder %s2617_s18, %s2613_s15 }
 0xdce   : > { %p2615_p7 = pnand %p2614_p6, %p2763_p4 }
 0xdcf   : > { %p2620_p12 = por %p2619_p11, %p2618_p10 }
 0xdd0   : > { %p2616_p9 = pneg %p2615_p7 }
 0xdd2   : > { %p2621_p13 = pnand %p2620_p12, %p2616_p9 }
 0xdd4   : > { %2624 = shalt.err (!%p2621_p13)
}
 0xdd5   : > { %2521 = dma.vmem_to_hbm [thread:$0]  (%p2763_p4), %s2055_s20, 128, %s3094_s30, %s2040_s8  }
 0xdd6 PF: > { %p2527_p0 = scmp.ge.s32.totalorder %s2675_s29, 2  ;;  %s2066_s22 = sand.u32 1, %s2655_s24  }
 0xdd7   : > { %s2067_s10 = scalar_lea.sflag [#allocation4], %s2066_s22 }
 0xdd8   : > { %p2524_p1 = pnand %p2527_p0, %p2770_p8 }
 0xdda   : > { %p2525_p2 = pneg %p2524_p1 }
 0xddc   : > { %2650 = dma.done.wait (%p2525_p2), %s2067_s10, 128  }
 0xddd   : > { %2652 = vsyncadd (%p2525_p2), %s2067_s10, 4294967168  ;;  %s20_s29 = sadd.s32 1, %s2675_s29   ;;  %s3145_s24 = smov %s2659_s25 }
 0xdde   : > { %p17_p3 = scmp.ge.s32.totalorder %s20_s29, 4   ;;  %s3146_s25 = smov %s2663_s26 }
 0xddf   : > { %s3147_s26 = smov %s2776_s14  ;;  %s3148_s27 = smov %s2671_s28 }
 0xde0   : > { %s3149_s28 = smov %s3151_s9  ;;  %19 = sbr.rel (!%p17_p3) target bundleno = 4 (0x4), region = 95 }
 0xde5   :  { %2072 = vsyncpa [#allocation4], 1 }
 0xde6   :  { %2074 = vsyncpa [#allocation4 + $0x1], 1 }

// kernel: tpu_custom_call.1
= control target key start
LH: loop header
LB: loop body
LE: loop exit
PB: predicated region body
PF: predicated region fallthrough
CT: control target
= control target key end

     0   :  { %12 = vsyncpa [#allocation4], 0  ;;  %s3135_s0 = inlined_call_operand.vmem [shape: f32[2,8,32], index: 0, kind: input, shape index: {}]   ;;  %s3136_s1 = inlined_call_operand.vmem [shape: f32[2,16,32], index: 1, kind: input, shape index: {}]   ;;  %s3137_s2 = inlined_call_operand.vmem [shape: f32[1,32], index: 2, kind: input, shape index: {}]   ;;  %s3138_s3 = inlined_call_operand.vmem [shape: f32[4,32,8], index: 3, kind: input, shape index: {}]   ;;  %s3139_s4 = inlined_call_operand.vmem [shape: f32[4,32,8], index: 4, kind: input, shape index: {}]   ;;  %s3140_s5 = inlined_call_operand.vmem [shape: f32[4,32,8], index: 5, kind: input, shape index: {}]   ;;  %s3141_s6 = inlined_call_operand.vmem [shape: f32[32,32], index: 6, kind: input, shape index: {}]   ;;  %s3142_s7 = inlined_call_operand.hbm [shape: f32[2,8,32], index: 7, kind: output, shape index: {}]  }
   0x1   :  { %14 = vsyncpa [#allocation4 + $0x1], 0  ;;  %s2723_s24 = smov 0   ;;  %s2725_s25 = smov 0  }
   0x2   :  { %s2727_s26 = smov 0   ;;  %s2729_s27 = smov 0  }
   0x3   :  { %s2731_s28 = smov 0   ;;  %s2733_s29 = smov 0  }
   0x4 LB: > { %s2137_s30 = sadd.s32 4294967295, %s2675_s29   ;;  %s2138_s8 = sadd.s32 4294967294, %s2675_s29   ;;  %s2675_s29 = sphi %s2733_s29, %s20_s29   ;;  %s2671_s28 = sphi %s2731_s28, %s3149_s28   ;;  %s2667_s27 = sphi %s2729_s27, %s3148_s27   ;;  %s2663_s26 = sphi %s2727_s26, %s3147_s26   ;;  %s2659_s25 = sphi %s2725_s25, %s3146_s25   ;;  %s2655_s24 = sphi %s2723_s24, %s3145_s24  }
   0x5   : > { %s32_s9 = sadd.s32 1, %s2671_s28  ;;  %s200_s10 = sadd.s32 1, %s2663_s26 }
   0x6   : > { %p34_p0 = scmp.ge.s32.totalorder %s32_s9, 2  ;;  %p210_p1 = scmp.ne.s32.totalorder %s2663_s26, %s2659_s25 }
   0x7   : > { %p211_p2 = scmp.eq.s32.totalorder %s2137_s30, 1  ;;  %p216_p3 = scmp.ne.s32.totalorder %s2659_s25, %s2655_s24 }
   0x8   : > { %s3151_s9 = smov (%p34_p0, %s32_s9), 0  ;;  %p217_p5 = scmp.eq.s32.totalorder %s2138_s8, 1 }
   0x9   : > { %p2763_p4 = por %p211_p2, %p210_p1  ;;  %s195_s12 = ssub.s32 %s2671_s28, %s3151_s9 }
   0xa   : > { %p2141_p6 = scmp.ge.s32.totalorder %s2675_s29, 1  ;;  %p198_p7 = scmp.eq.s32.totalorder %s195_s12, 0 }
   0xb   : > { %p2770_p8 = por %p217_p5, %p216_p3  ;;  %p268_p9 = scmp.lt.s32.totalorder %s2675_s29, 3 }
   0xc   : > { %s2776_s14 = scalar_select %p198_p7, %s2663_s26, %s200_s10  }
   0xd   : > { %p269_p10 = pnand %p2141_p6, %p268_p9 }
   0xe   : > { %p307_p11 = scmp.lt.s32.totalorder (!%p269_p10), %s2667_s27, 1  ;;  %s2679_s18 = smov (!%p269_p10), 8  }
   0xf   : > { %272 = sbr.rel (%p269_p10) target bundleno = 3542 (0xdd6), region = 48  ;;  %s2680_s19 = smov (!%p269_p10), 16  }
  0x14   : > { %s308_s15 = scalar_select %p307_p11, %s2667_s27, 1  ;;  %vm323_vm0 = vcmask 261120   ;;  %v420_v4 = vld [vmem:[%s3139_s4 + $0x18] sm:$0xff]  ;;  %v419_v5 = vld [vmem:[%s3139_s4 + $0x10] sm:$0xff]  ;;  %v418_v6 = vld [vmem:[%s3139_s4 + $0x8] sm:$0xff]  ;;  %v2677_v7 = vmov 0.0  }
  0x15   : > { %2333 = vmatprep.subr.mxu1 %v420_v4  ;;  %2322 = vmatprep.subr.mxu0 %v2677_v7  ;;  %v343_v8 = vld [vmem:[%s3138_s3 + $0x18] sm:$0xff]  ;;  %v342_v9 = vld [vmem:[%s3138_s3 + $0x10] sm:$0xff]  ;;  %v417_v10 = vld [vmem:[%s3139_s4] sm:$0xff]  ;;  %vm2678_vm1 = vmmov 0   ;;  %vm581_vm2 = vcmask 64512   ;;  %vm661_vm3 = vcmask 130048  }
  0x16   : > { %s2143_s16 = sshll.u32 %s308_s15, 3  ;;  %s2224_s17 = sshll.u32 %s308_s15, 4  ;;  %2334 = vmatpush3.msra.mxu1 %v420_v4  ;;  %2323 = vmatpush3.msra.mxu0 %v343_v8  ;;  %v341_v11 = vld [vmem:[%s3138_s3 + $0x8] sm:$0xff]  ;;  %v340_v13 = vld [vmem:[%s3138_s3] sm:$0xff]  ;;  %v505_v25 = vld [vmem:[%s3140_s5 + $0x18] sm:$0xff]  ;;  %vm1149_vm4 = vcmask 130112  }
  0x17   : > { %s313_s20 = scalar_lea.vmem %s3135_s0, %s2143_s16  ;;  %s318_s23 = scalar_lea.vmem %s3136_s1, %s2224_s17  ;;  %2335 = vmatprep.subr.mxu1 %v419_v5  ;;  %2324 = vmatprep.subr.mxu0 %v2677_v7  ;;  %v2146_v18 = vld [vmem:[%s3137_s2] ss:$0 sm:$0xff]  ;;  %v504_v26 = vld [vmem:[%s3140_s5 + $0x10] sm:$0xff]  ;;  %v503_v27 = vld [vmem:[%s3140_s5 + $0x8] sm:$0xff]  ;;  %vm1553_vm5 = vcmask 195712   ;;  %vm1957_vm6 = vcmask 261312  }
  0x18   : > { %v2786_v0 = vld [vmem:[%s313_s20] sm:$0xff]  ;;  %2336 = vmatpush3.msra.mxu1 %v419_v5  ;;  %v2818_v12 = vld [vmem:[%s318_s23 + $0x8] sm:$0xff]  ;;  %2325 = vmatpush3.msra.mxu0 %v342_v9  ;;  %v2164_v37 = vld [vmem:[%s3139_s4 + $0x38] sm:$0xff]  ;;  %s2681_s15 = smov 24   ;;  %s304_s16 = sand.u32 1, %s2659_s25  }
  0x19   : > { %v2788_v1 = vld [vmem:[%s318_s23] sm:$0xff]  ;;  %v322_v2 = vmul.f32 %v2786_v0, %v2786_v0  ;;  %2337 = vmatprep.subr.mxu1 %v418_v6  ;;  %2326 = vmatprep.subr.mxu0 %v2677_v7  ;;  %v2163_v38 = vld [vmem:[%s3139_s4 + $0x30] sm:$0xff]  ;;  %v2162_v40 = vld [vmem:[%s3139_s4 + $0x28] sm:$0xff]  ;;  %s2142_s17 = sshll.u32 %s304_s16, 3  ;;  %s2040_s8 = scalar_lea.sflag [#allocation4], %s304_s16 }
  0x1a   : > { %2341 = vmatprep.mubr.msk.f32.mxu1 %vm323_vm0, %v2788_v1  ;;  %2338 = vmatpush3.msra.mxu1 %v418_v6  ;;  %v502_v28 = vld [vmem:[%s3140_s5] sm:$0xff]  ;;  %v2159_v46 = vld [vmem:[%s3138_s3 + $0x38] sm:$0xff]  ;;  %v2158_v47 = vld [vmem:[%s3138_s3 + $0x30] sm:$0xff] }
  0x1b   : > { %v324_v3 = vsel %vm323_vm0, %v322_v2, 0.0  ;;  %2339 = vmatprep.subr.mxu1 %v417_v10  ;;  %2327 = vmatpush3.msra.mxu0 %v341_v11  ;;  %v2161_v42 = vld [vmem:[%s3139_s4 + $0x20] sm:$0xff]  ;;  %v2157_v48 = vld [vmem:[%s3138_s3 + $0x28] sm:$0xff]  ;;  %v2180_v54 = vld [vmem:[%s3138_s3 + $0x58] sm:$0xff] }
  0x1c   : > { %325 = vadd.xlane.f32.xlu0 %v324_v3  ;;  %2340 = vmatpush3.msra.mxu1 %v417_v10  ;;  %v2156_v49 = vld [vmem:[%s3138_s3 + $0x20] sm:$0xff]  ;;  %v2179_v56 = vld [vmem:[%s3138_s3 + $0x50] sm:$0xff]  ;;  %v2178_v58 = vld [vmem:[%s3138_s3 + $0x48] sm:$0xff] }
  0x1d   : > { %2342 = vmatmul.mubr.msk.f32.vlgmr.msra.gmra.mxu1 %vm323_vm0, %v2818_v12  ;;  %2328 = vmatprep.subr.mxu0 %v2677_v7  ;;  %v2177_v59 = vld [vmem:[%s3138_s3 + $0x40] sm:$0xff]  ;;  %v2170_v60 = vld [vmem:[%s3140_s5 + $0x38] sm:$0xff]  ;;  %v2169_v61 = vld [vmem:[%s3140_s5 + $0x30] sm:$0xff] }
  0x1e   : > { %2329 = vmatpush3.msra.mxu0 %v340_v13  ;;  %2330 = vmatprep.mubr.msk.f32.mxu0 %vm2678_vm1, %v2677_v7  ;;  %v2168_v62 = vld [vmem:[%s3140_s5 + $0x28] sm:$0xff]  ;;  %v2167_v63 = vld [vmem:[%s3140_s5 + $0x20] sm:$0xff] }
  0x1f   : > { %2355 = vmatprep.subr.mxu1 %v2677_v7  ;;  %2359 = vmatprep.mubr.msk.f32.mxu1 %vm2678_vm1, %v2677_v7 }
  0x20   : > { %2344 = vmatprep.subr.mxu0 %v505_v25 }
  0xa5   : > { %v326_v14 = vpop.xlane.xlu0 %325 }
  0xa6   : > { %v328_v15 = vmul.f32 0.03125, %v326_v14 }
  0xa8   : > { %v329_v16 = vadd.f32 1e-06, %v328_v15  ;;  %v2185_v15 = vld [vmem:[%s3139_s4 + $0x58] sm:$0xff] }
  0xaa   : > { %2581 = vrsqrt.f32 %v329_v16 }
  0xb7   : > { %v2582_v17 = vpop.eup %2581 }
  0xb8   : > { %v331_v19 = vmul.f32 %v2582_v17, %v2786_v0 }
  0xba   : > { %v2836_v20 = vmul.f32 %v2146_v18, %v331_v19 }
  0xbc   : > { %2331 = vmatmul.mubr.msk.f32.vlgmr.msra.gmra.mxu0 %vm323_vm0, %v2836_v20 }
  0xbd   : > { %2352 = vmatprep.mubr.msk.f32.mxu0 %vm323_vm0, %v2788_v1  ;;  %2345 = vmatpush3.msra.mxu0 %v505_v25 }
  0xbe   : > { %2346 = vmatprep.subr.mxu0 %v504_v26 }
  0xbf   : > { %2347 = vmatpush3.msra.mxu0 %v504_v26 }
  0xc0   : > { %2348 = vmatprep.subr.mxu0 %v503_v27 }
  0xc1   : > { %2349 = vmatpush3.msra.mxu0 %v503_v27 }
  0xc2   : > { %2350 = vmatprep.subr.mxu0 %v502_v28 }
  0xc3   : > { %2351 = vmatpush3.msra.mxu0 %v502_v28  ;;  %v2201_v28 = vld [vmem:[%s3138_s3 + $0x78] sm:$0xff] }
  0xc4   : > { %2353 = vmatmul.mubr.msk.f32.vlgmr.msra.gmra.mxu0 %vm323_vm0, %v2818_v12  ;;  %2380 = vmatprep.subr.mxu0 %v2164_v37 }
  0xc5   : > { %2388 = vmatprep.mubr.msk.f32.mxu0 %vm323_vm0, %v2788_v1  ;;  %2381 = vmatpush3.msra.mxu0 %v2164_v37 }
  0xc6   : > { %2382 = vmatprep.subr.mxu0 %v2163_v38 }
  0xc7   : > { %2383 = vmatpush3.msra.mxu0 %v2163_v38 }
  0xc8   : > { %2384 = vmatprep.subr.mxu0 %v2162_v40 }
  0xc9   : > { %2385 = vmatpush3.msra.mxu0 %v2162_v40 }
  0xca   : > { %2386 = vmatprep.subr.mxu0 %v2161_v42 }
  0xcb   : > { %2387 = vmatpush3.msra.mxu0 %v2161_v42 }
  0xcc   : > { %2389 = vmatmul.mubr.msk.f32.vlgmr.msra.gmra.mxu0 %vm323_vm0, %v2818_v12  ;;  %2402 = vmatprep.subr.mxu0 %v2677_v7 }
  0xcd   : > { %2406 = vmatprep.mubr.msk.f32.mxu0 %vm2678_vm1, %v2677_v7 }
  0xdd   : > { %v2343_v21 = vpop.f32.mrf.mxu1 }
  0xde   : > { %2356 = vmatpush3.xpose.msk.msra.mxu1 %vm581_vm2, %v2343_v21  ;;  %v2184_v21 = vld [vmem:[%s3139_s4 + $0x50] sm:$0xff] }
  0xdf   : > { %v493_v22 = vpop.f32.mrf.mxu1  ;;  %2357 = vmatprep.subr.mxu1 %v2677_v7 }
  0xe2   : > { %2358 = vmatpush3.xpose.msk.msra.mxu1 %vm581_vm2, %v493_v22  ;;  %v2183_v22 = vld [vmem:[%s3139_s4 + $0x48] sm:$0xff] }
  0xe3   : > { %2362 = vmatprep.subr.mxu1 %v2677_v7 }
 0x17c   : > { %v413_v23 = vpop.f32.mrf.mxu0 }
 0x17d   : > { %2360 = vmatmul.mubr.msk.f32.vlgmr.msra.gmra.mxu1 %vm581_vm2, %v413_v23  ;;  %v2182_v23 = vld [vmem:[%s3139_s4 + $0x40] sm:$0xff] }
 0x17e   : > { %v2332_v24 = vpop.f32.mrf.mxu0  ;;  %2366 = vmatprep.mubr.msk.f32.mxu1 %vm2678_vm1, %v2677_v7 }
 0x184   : > { %v2354_v39 = vpop.f32.mrf.mxu0 }
 0x185   : > { %2363 = vmatpush3.msra.mxu1 %v2354_v39 }
 0x186   : > { %v572_v41 = vpop.f32.mrf.mxu0  ;;  %2364 = vmatprep.subr.mxu1 %v2677_v7 }
 0x187   : > { %2365 = vmatpush3.msra.mxu1 %v572_v41 }
 0x188   : > { %2369 = vmatprep.subr.mxu1 %v2677_v7 }
 0x18c   : > { %v2390_v50 = vpop.f32.mrf.mxu0 }
 0x18d   : > { %2403 = vmatpush3.xpose.msk.msra.mxu0 %vm581_vm2, %v2390_v50 }
 0x18e   : > { %2404 = vmatprep.subr.mxu0 %v2677_v7  ;;  %v893_v51 = vpop.f32.mrf.mxu0 }
 0x191   : > { %2405 = vmatpush3.xpose.msk.msra.mxu0 %vm581_vm2, %v893_v51  ;;  %v2205_v51 = vld [vmem:[%s3139_s4 + $0x70] sm:$0xff] }
 0x192   : > { %2416 = vmatprep.subr.mxu0 %v2677_v7 }
 0x23d   : > { %v657_v29 = vpop.f32.mrf.mxu1 }
 0x23e   : > { %v662_v30 = vsel %vm661_vm3, %v657_v29, -inf }
 0x23f   : > { %663 = vmax.xlane.f32.xlu0 %v662_v30  ;;  %v2361_v31 = vpop.f32.mrf.mxu1  ;;  %v2199_v30 = vld [vmem:[%s3138_s3 + $0x68] sm:$0xff] }
 0x240   : > { %v2198_v31 = vld [vmem:[%s3138_s3 + $0x60] sm:$0xff] }
 0x2c8   : > { %v664_v32 = vpop.xlane.xlu0 %663 }
 0x2c9   : > { %v665_v33 = vsub.f32 %v657_v29, %v664_v32  ;;  %v2200_v29 = vld [vmem:[%s3138_s3 + $0x70] sm:$0xff]  ;;  %v2191_v32 = vld [vmem:[%s3140_s5 + $0x58] sm:$0xff] }
 0x2cb   : > { %v666_v34 = vmul.f32 1.442695, %v665_v33  ;;  %v2190_v33 = vld [vmem:[%s3140_s5 + $0x50] sm:$0xff] }
 0x2cd   : > { %2583 = vpow2.f32 %v666_v34  ;;  %v2189_v34 = vld [vmem:[%s3140_s5 + $0x48] sm:$0xff] }
 0x2da   : > { %v2584_v35 = vpop.eup %2583 }
 0x2db   : > { %v668_v36 = vsel %vm661_vm3, %v2584_v35, 0.0 }
 0x2dc   : > { %669 = vadd.xlane.f32.xlu1 %v668_v36 }
 0x365   : > { %v670_v43 = vpop.xlane.xlu1 %669 }
 0x366   : > { %2585 = vrcp.f32 %v670_v43 }
 0x373   : > { %v2586_v44 = vpop.eup %2585 }
 0x374   : > { %v672_v45 = vmul.f32 %v2586_v44, %v2584_v35 }
 0x376   : > { %2367 = vmatmul.mubr.msk.f32.vlgmr.msra.gmra.mxu1 %vm661_vm3, %v672_v45 }
 0x377   : > { %2370 = vmatpush3.msra.mxu1 %v2159_v46  ;;  %2377 = vmatprep.mubr.msk.f32.mxu1 %vm2678_vm1, %v2677_v7  ;;  %v2206_v46 = vld [vmem:[%s3139_s4 + $0x78] sm:$0xff] }
 0x378   : > { %2371 = vmatprep.subr.mxu1 %v2677_v7 }
 0x379   : > { %2372 = vmatpush3.msra.mxu1 %v2158_v47 }
 0x37a   : > { %2373 = vmatprep.subr.mxu1 %v2677_v7 }
 0x37b   : > { %2374 = vmatpush3.msra.mxu1 %v2157_v48 }
 0x37c   : > { %2375 = vmatprep.subr.mxu1 %v2677_v7 }
 0x37d   : > { %2376 = vmatpush3.msra.mxu1 %v2156_v49 }
 0x37e   : > { %2378 = vmatmul.mubr.msk.f32.vlgmr.msra.gmra.mxu1 %vm323_vm0, %v2836_v20  ;;  %2391 = vmatprep.subr.mxu1 %v2170_v60 }
 0x37f   : > { %2399 = vmatprep.mubr.msk.f32.mxu1 %vm323_vm0, %v2788_v1  ;;  %2392 = vmatpush3.msra.mxu1 %v2170_v60  ;;  %v2209_v60 = vld [vmem:[%s3140_s5 + $0x60] sm:$0xff] }
 0x380   : > { %2393 = vmatprep.subr.mxu1 %v2169_v61 }
 0x381   : > { %2394 = vmatpush3.msra.mxu1 %v2169_v61 }
 0x382   : > { %2395 = vmatprep.subr.mxu1 %v2168_v62 }
 0x383   : > { %2396 = vmatpush3.msra.mxu1 %v2168_v62 }
 0x384   : > { %2397 = vmatprep.subr.mxu1 %v2167_v63 }
 0x385   : > { %2398 = vmatpush3.msra.mxu1 %v2167_v63 }
 0x386   : > { %2400 = vmatmul.mubr.msk.f32.vlgmr.msra.gmra.mxu1 %vm323_vm0, %v2818_v12  ;;  %2409 = vmatprep.subr.mxu1 %v2677_v7 }
 0x387   : > { %2413 = vmatprep.mubr.msk.f32.mxu1 %vm2678_vm1, %v2677_v7 }
 0x436   : > { %v742_v52 = vpop.f32.mrf.mxu1 }
 0x437   : > { %746 = vst.msk [vmem:[#allocation2] sm:$0xff] %vm581_vm2, %v742_v52  ;;  %v2204_v52 = vld [vmem:[%s3139_s4 + $0x68] sm:$0xff] }
 0x438   : > { %v2368_v53 = vpop.f32.mrf.mxu1 }
 0x439   : > { %v2203_v53 = vld [vmem:[%s3139_s4 + $0x60] sm:$0xff] }
 0x43e   : > { %v818_v55 = vpop.f32.mrf.mxu1 }
 0x43f   : > { %2407 = vmatmul.mubr.msk.f32.vlgmr.msra.gmra.mxu0 %vm581_vm2, %v818_v55 }
 0x440   : > { %2417 = vmatpush3.msra.mxu0 %v2180_v54  ;;  %v2379_v57 = vpop.f32.mrf.mxu1  ;;  %2424 = vmatprep.mubr.msk.f32.mxu0 %vm2678_vm1, %v2677_v7 }
 0x441   : > { %2418 = vmatprep.subr.mxu0 %v2677_v7  ;;  %v2212_v57 = vld [vmem:[%s3140_s5 + $0x78] sm:$0xff] }
 0x442   : > { %2419 = vmatpush3.msra.mxu0 %v2179_v56 }
 0x443   : > { %2420 = vmatprep.subr.mxu0 %v2677_v7 }
 0x444   : > { %2421 = vmatpush3.msra.mxu0 %v2178_v58  ;;  %v2211_v58 = vld [vmem:[%s3140_s5 + $0x70] sm:$0xff] }
 0x445   : > { %2422 = vmatprep.subr.mxu0 %v2677_v7 }
 0x446   : > { %2423 = vmatpush3.msra.mxu0 %v2177_v59  ;;  %v2401_v14 = vpop.f32.mrf.mxu1  ;;  %v2210_v59 = vld [vmem:[%s3140_s5 + $0x68] sm:$0xff] }
 0x447   : > { %2425 = vmatmul.mubr.msk.f32.vlgmr.msra.gmra.mxu0 %vm323_vm0, %v2836_v20  ;;  %2410 = vmatpush3.msra.mxu1 %v2401_v14 }
 0x448   : > { %2446 = vmatprep.mubr.msk.f32.mxu0 %vm323_vm0, %v2788_v1  ;;  %v973_v16 = vpop.f32.mrf.mxu1  ;;  %2411 = vmatprep.subr.mxu1 %v2677_v7 }
 0x449   : > { %2412 = vmatpush3.msra.mxu1 %v973_v16  ;;  %2438 = vmatprep.subr.mxu0 %v2191_v32  ;;  %v1962_v16 = vld [vmem:[%s3141_s6 + $0x10] sm:$0xff] }
 0x44a   : > { %2427 = vmatprep.subr.mxu1 %v2185_v15  ;;  %2439 = vmatpush3.msra.mxu0 %v2191_v32 }
 0x44b   : > { %2440 = vmatprep.subr.mxu0 %v2190_v33 }
 0x44c   : > { %2441 = vmatpush3.msra.mxu0 %v2190_v33 }
 0x44d   : > { %2442 = vmatprep.subr.mxu0 %v2189_v34 }
 0x44e   : > { %2443 = vmatpush3.msra.mxu0 %v2189_v34 }
 0x4ff   : > { %v1057_v2 = vpop.f32.mrf.mxu0 }
 0x500   : > { %v1061_v3 = vsel %vm661_vm3, %v1057_v2, -inf }
 0x501   : > { %1062 = vmax.xlane.f32.xlu1 %v1061_v3  ;;  %v2408_v4 = vpop.f32.mrf.mxu0 }
 0x507   : > { %v1222_v5 = vpop.f32.mrf.mxu0 }
 0x509   : > { %v2426_v6 = vpop.f32.mrf.mxu0 }
 0x58a   : > { %v1063_v8 = vpop.xlane.xlu1 %1062 }
 0x58b   : > { %v1064_v9 = vsub.f32 %v1057_v2, %v1063_v8 }
 0x58d   : > { %v1065_v10 = vmul.f32 1.442695, %v1064_v9 }
 0x58f   : > { %2587 = vpow2.f32 %v1065_v10 }
 0x59c   : > { %v2588_v11 = vpop.eup %2587 }
 0x59d   : > { %v1067_v13 = vsel %vm661_vm3, %v2588_v11, 0.0 }
 0x59e   : > { %1068 = vadd.xlane.f32.xlu0 %v1067_v13 }
 0x627   : > { %v1069_v17 = vpop.xlane.xlu0 %1068 }
 0x628   : > { %2589 = vrcp.f32 %v1069_v17  ;;  %v1961_v17 = vld [vmem:[%s3141_s6 + $0x8] sm:$0xff] }
 0x635   : > { %v2590_v18 = vpop.eup %2589 }
 0x636   : > { %v1071_v19 = vmul.f32 %v2590_v18, %v2588_v11  ;;  %v1960_v18 = vld [vmem:[%s3141_s6] sm:$0xff] }
 0x638   : > { %2414 = vmatmul.mubr.msk.f32.vlgmr.msra.gmra.mxu1 %vm661_vm3, %v1071_v19 }
 0x639   : > { %2428 = vmatpush3.msra.mxu1 %v2185_v15  ;;  %2435 = vmatprep.mubr.msk.f32.mxu1 %vm323_vm0, %v2788_v1  ;;  %v1963_v15 = vld [vmem:[%s3141_s6 + $0x18] sm:$0xff] }
 0x63a   : > { %2429 = vmatprep.subr.mxu1 %v2184_v21 }
 0x63b   : > { %2430 = vmatpush3.msra.mxu1 %v2184_v21 }
 0x63c   : > { %2431 = vmatprep.subr.mxu1 %v2183_v22 }
 0x63d   : > { %2432 = vmatpush3.msra.mxu1 %v2183_v22 }
 0x63e   : > { %2433 = vmatprep.subr.mxu1 %v2182_v23 }
 0x63f   : > { %2434 = vmatpush3.msra.mxu1 %v2182_v23 }
 0x640   : > { %2436 = vmatmul.mubr.msk.f32.vlgmr.msra.gmra.mxu1 %vm323_vm0, %v2818_v12  ;;  %2449 = vmatprep.subr.mxu1 %v2677_v7 }
 0x641   : > { %2453 = vmatprep.mubr.msk.f32.mxu1 %vm2678_vm1, %v2677_v7 }
 0x6f8   : > { %v2975_v24 = vpop.f32.mrf.mxu1 }
 0x6fa   : > { %v2415_v25 = vpop.f32.mrf.mxu1 }
 0x700   : > { %v2437_v26 = vpop.f32.mrf.mxu1 }
 0x701   : > { %2450 = vmatpush3.xpose.msk.msra.mxu1 %vm581_vm2, %v2437_v26 }
 0x702   : > { %2451 = vmatprep.subr.mxu1 %v2677_v7  ;;  %v1297_v27 = vpop.f32.mrf.mxu1 }
 0x705   : > { %2452 = vmatpush3.xpose.msk.msra.mxu1 %vm581_vm2, %v1297_v27 }
 0x706   : > { %2463 = vmatprep.subr.mxu1 %v2677_v7 }
 0x708   : > { %2454 = vmatmul.mubr.msk.f32.vlgmr.msra.gmra.mxu1 %vm581_vm2, %v1222_v5 }
 0x709   : > { %2464 = vmatpush3.msra.mxu1 %v2201_v28  ;;  %2471 = vmatprep.mubr.msk.f32.mxu1 %vm2678_vm1, %v2677_v7 }
 0x70a   : > { %2465 = vmatprep.subr.mxu1 %v2677_v7 }
 0x70b   : > { %2466 = vmatpush3.msra.mxu1 %v2200_v29 }
 0x70c   : > { %2467 = vmatprep.subr.mxu1 %v2677_v7 }
 0x70d   : > { %2468 = vmatpush3.msra.mxu1 %v2199_v30 }
 0x70e   : > { %2469 = vmatprep.subr.mxu1 %v2677_v7 }
 0x70f   : > { %2470 = vmatpush3.msra.mxu1 %v2198_v31 }
 0x710   : > { %2472 = vmatmul.mubr.msk.f32.vlgmr.msra.gmra.mxu1 %vm323_vm0, %v2836_v20  ;;  %v2188_v20 = vld [vmem:[%s3140_s5 + $0x40] sm:$0xff]  ;;  %2485 = vmatprep.subr.mxu1 %v2212_v57 }
 0x711   : > { %2493 = vmatprep.mubr.msk.f32.mxu1 %vm323_vm0, %v2788_v1  ;;  %2444 = vmatprep.subr.mxu0 %v2188_v20 }
 0x712   : > { %2445 = vmatpush3.msra.mxu0 %v2188_v20  ;;  %2486 = vmatpush3.msra.mxu1 %v2212_v57 }
 0x713   : > { %2447 = vmatmul.mubr.msk.f32.vlgmr.msra.gmra.mxu0 %vm323_vm0, %v2818_v12  ;;  %2456 = vmatprep.subr.mxu0 %v2677_v7 }
 0x714   : > { %2460 = vmatprep.mubr.msk.f32.mxu0 %vm2678_vm1, %v2677_v7  ;;  %2487 = vmatprep.subr.mxu1 %v2211_v58 }
 0x715   : > { %2488 = vmatpush3.msra.mxu1 %v2211_v58 }
 0x716   : > { %2489 = vmatprep.subr.mxu1 %v2210_v59 }
 0x717   : > { %2490 = vmatpush3.msra.mxu1 %v2210_v59 }
 0x718   : > { %2491 = vmatprep.subr.mxu1 %v2209_v60 }
 0x719   : > { %2492 = vmatpush3.msra.mxu1 %v2209_v60 }
 0x71a   : > { %2494 = vmatmul.mubr.msk.f32.vlgmr.msra.gmra.mxu1 %vm323_vm0, %v2818_v12  ;;  %2503 = vmatprep.subr.mxu1 %v2677_v7 }
 0x71b   : > { %2507 = vmatprep.mubr.msk.f32.mxu1 %vm2678_vm1, %v2677_v7 }
 0x7c8   : > { %v1461_v35 = vpop.f32.mrf.mxu1 }
 0x7c9   : > { %v1465_v36 = vsel %vm661_vm3, %v1461_v35, -inf }
 0x7ca   : > { %1466 = vmax.xlane.f32.xlu1 %v1465_v36  ;;  %v2455_v37 = vpop.f32.mrf.mxu1 }
 0x7d0   : > { %v1626_v38 = vpop.f32.mrf.mxu1 }
 0x7d2   : > { %v2473_v39 = vpop.f32.mrf.mxu1 }
 0x7d3   : > { %v2448_v45 = vpop.f32.mrf.mxu0 }
 0x7d4   : > { %2457 = vmatpush3.msra.mxu0 %v2448_v45 }
 0x7d5   : > { %v1377_v47 = vpop.f32.mrf.mxu0  ;;  %2458 = vmatprep.subr.mxu0 %v2677_v7 }
 0x7d6   : > { %2459 = vmatpush3.msra.mxu0 %v1377_v47 }
 0x7d7   : > { %2474 = vmatprep.subr.mxu0 %v2206_v46 }
 0x7da   : > { %v2495_v8 = vpop.f32.mrf.mxu1 }
 0x7db   : > { %2504 = vmatpush3.msra.mxu1 %v2495_v8 }
 0x7dc   : > { %v1781_v9 = vpop.f32.mrf.mxu1  ;;  %2505 = vmatprep.subr.mxu1 %v2677_v7 }
 0x7dd   : > { %2506 = vmatpush3.msra.mxu1 %v1781_v9 }
 0x853   : > { %v1467_v40 = vpop.xlane.xlu1 %1466 }
 0x854   : > { %v1468_v41 = vsub.f32 %v1461_v35, %v1467_v40 }
 0x856   : > { %v1469_v42 = vmul.f32 1.442695, %v1468_v41 }
 0x858   : > { %2591 = vpow2.f32 %v1469_v42 }
 0x865   : > { %v2592_v43 = vpop.eup %2591 }
 0x866   : > { %v1471_v44 = vsel %vm661_vm3, %v2592_v43, 0.0 }
 0x867   : > { %1472 = vadd.xlane.f32.xlu0 %v1471_v44 }
 0x8f0   : > { %v1473_v48 = vpop.xlane.xlu0 %1472 }
 0x8f1   : > { %2593 = vrcp.f32 %v1473_v48 }
 0x8fe   : > { %v2594_v49 = vpop.eup %2593 }
 0x8ff   : > { %v1475_v50 = vmul.f32 %v2594_v49, %v2592_v43 }
 0x901   : > { %2461 = vmatmul.mubr.msk.f32.vlgmr.msra.gmra.mxu0 %vm661_vm3, %v1475_v50 }
 0x902   : > { %2475 = vmatpush3.msra.mxu0 %v2206_v46  ;;  %2482 = vmatprep.mubr.msk.f32.mxu0 %vm323_vm0, %v2788_v1 }
 0x903   : > { %2476 = vmatprep.subr.mxu0 %v2205_v51 }
 0x904   : > { %2477 = vmatpush3.msra.mxu0 %v2205_v51 }
 0x905   : > { %2478 = vmatprep.subr.mxu0 %v2204_v52 }
 0x906   : > { %2479 = vmatpush3.msra.mxu0 %v2204_v52 }
 0x907   : > { %2480 = vmatprep.subr.mxu0 %v2203_v53 }
 0x908   : > { %2481 = vmatpush3.msra.mxu0 %v2203_v53 }
 0x909   : > { %2483 = vmatmul.mubr.msk.f32.vlgmr.msra.gmra.mxu0 %vm323_vm0, %v2818_v12  ;;  %2496 = vmatprep.subr.mxu0 %v2677_v7 }
 0x90a   : > { %2500 = vmatprep.mubr.msk.f32.mxu0 %vm2678_vm1, %v2677_v7 }
 0x9c1   : > { %v1545_v54 = vpop.f32.mrf.mxu0 }
 0x9c3   : > { %v2462_v1 = vpop.f32.mrf.mxu0 }
 0x9c9   : > { %v2484_v55 = vpop.f32.mrf.mxu0 }
 0x9ca   : > { %2497 = vmatpush3.xpose.msk.msra.mxu0 %vm581_vm2, %v2484_v55 }
 0x9cb   : > { %2498 = vmatprep.subr.mxu0 %v2677_v7  ;;  %v1701_v56 = vpop.f32.mrf.mxu0 }
 0x9ce   : > { %2499 = vmatpush3.xpose.msk.msra.mxu0 %vm581_vm2, %v1701_v56 }
 0x9cf   : > { %2510 = vmatprep.subr.mxu0 %v2677_v7 }
 0x9d1   : > { %2501 = vmatmul.mubr.msk.f32.vlgmr.msra.gmra.mxu0 %vm581_vm2, %v1626_v38 }
 0x9d2   : > { %2518 = vmatprep.mubr.msk.f32.mxu0 %vm2678_vm1, %v2677_v7  ;;  %2511 = vmatpush3.msra.mxu0 %v1963_v15 }
 0x9d3   : > { %2512 = vmatprep.subr.mxu0 %v2677_v7 }
 0x9d4   : > { %2513 = vmatpush3.msra.mxu0 %v1962_v16 }
 0x9d5   : > { %2514 = vmatprep.subr.mxu0 %v2677_v7 }
 0x9d6   : > { %2515 = vmatpush3.msra.mxu0 %v1961_v17 }
 0x9d7   : > { %2516 = vmatprep.subr.mxu0 %v2677_v7 }
 0x9d8   : > { %2517 = vmatpush3.msra.mxu0 %v1960_v18 }
 0xa91   : > { %v1865_v61 = vpop.f32.mrf.mxu0 }
 0xa92   : > { %v1869_v62 = vsel %vm661_vm3, %v1865_v61, -inf }
 0xa93   : > { %1870 = vmax.xlane.f32.xlu1 %v1869_v62  ;;  %v2502_v63 = vpop.f32.mrf.mxu0 }
 0xaa4   : > { %1146 = vrot.lane.b32.xlu1 %v2975_v24, %s2679_s18  ;;  %s2221_s18 = sshll.u32 %s2667_s27, 7  ;;  %s2682_s27 = smov [#allocation3]  }
 0xaa5   : > { %s3094_s30 = scalar_lea.hbm %s3142_s7, %s2221_s18  ;;  %s2603_s12 = sshll.u32 %s2682_s27, 4  ;;  %s2604_s12 = int_to_ptr.vmem [resolvable:$false] %s2603_s12 }
 0xaa6   : > { %s2605_s23 = scalar_lea.vmem %s2604_s12, 256 }
 0xb1c   : > { %v1871_v2 = vpop.xlane.xlu1 %1870 }
 0xb1d   : > { %v1872_v3 = vsub.f32 %v1865_v61, %v1871_v2 }
 0xb1f   : > { %v1873_v4 = vmul.f32 1.442695, %v1872_v3 }
 0xb20   : > { %v1147_v5 = vpop.permute.xlu1 %1146 }
 0xb21   : > { %2595 = vpow2.f32 %v1873_v4  ;;  %1150 = vst.msk [vmem:[#allocation2] sm:$0xff] %vm1149_vm4, %v1147_v5 }
 0xb2e   : > { %v2596_v12 = vpop.eup %2595 }
 0xb2f   : > { %v1875_v6 = vsel %vm661_vm3, %v2596_v12, 0.0 }
 0xb30   : > { %1876 = vadd.xlane.f32.xlu0 %v1875_v6 }
 0xb46   : > { %1550 = vrot.lane.b32.xlu0 %v1545_v54, %s2680_s19  ;;  %s306_s19 = scalar_lea.vmem [#allocation3], %s2142_s17 }
 0xb47   : > { %s2054_s20 = sshll.u32 %s306_s19, 4  ;;  %s2055_s20 = int_to_ptr.vmem [resolvable:$true] %s2054_s20 }
 0xb48   : > { %s2599_s10 = scalar_lea.vmem %s2055_s20, 128  ;;  %p2606_p1 = scmp.lt.s32.totalorder %s2055_s20, %s2604_s12 }
 0xb49   : > { %p2600_p12 = scmp.ne.s32.totalorder %s2055_s20, %s2599_s10  ;;  %p2607_p2 = scmp.lt.s32.totalorder %s2605_s23, %s2599_s10 }
 0xb4b   : > { %p2601_p13 = pnand %p2600_p12, %p2763_p4  ;;  %p2608_p3 = por %p2607_p2, %p2606_p1 }
 0xb4d   : > { %p2602_p0 = pneg %p2601_p13 }
 0xb4f   : > { %p2609_p5 = pnand %p2608_p3, %p2602_p0 }
 0xbb9   : > { %v1877_v10 = vpop.xlane.xlu0 %1876 }
 0xbba   : > { %2597 = vrcp.f32 %v1877_v10 }
 0xbbd   : > { %v1551_v11 = vpop.permute.xlu0 %1550 }
 0xbbe   : > { %1554 = vst.msk [vmem:[#allocation2] sm:$0xff] %vm1553_vm5, %v1551_v11 }
 0xbc7   : > { %v2598_v13 = vpop.eup %2597 }
 0xbc8   : > { %v1879_v14 = vmul.f32 %v2598_v13, %v2596_v12 }
 0xbca   : > { %2508 = vmatmul.mubr.msk.f32.vlgmr.msra.gmra.mxu1 %vm661_vm3, %v1879_v14 }
 0xc8a   : > { %v1949_v19 = vpop.f32.mrf.mxu1 }
 0xc8b   : > { %1954 = vrot.lane.b32.xlu1 %v1949_v19, %s2681_s15 }
 0xc8c   : > { %v2509_v21 = vpop.f32.mrf.mxu1 }
 0xcfd   : > { %v1955_v22 = vpop.permute.xlu1 %1954 }
 0xcfe   : > { %1958 = vst.msk [vmem:[#allocation2] sm:$0xff] %vm1957_vm6, %v1955_v22 }
 0xd05   : > { %v1959_v23 = vld [vmem:[#allocation2] sm:$0xff] }
 0xd06   : > { %2519 = vmatmul.mubr.msk.f32.vlgmr.msra.gmra.mxu0 %vm323_vm0, %v1959_v23 }
 0xdc6   : > { %v2033_v24 = vpop.f32.mrf.mxu0 }
 0xdc7   : > { %v2037_v7 = vadd.f32 %v2033_v24, %v2786_v0 }
 0xdc8   : > { %v2520_v25 = vpop.f32.mrf.mxu0 }
 0xdc9   : > { %2038 = vst.msk [vmem:[%s306_s19] sm:$0xff] %vm323_vm0, %v2037_v7 }
 0xdca   : > { %2612 = shalt.err (!%p2609_p5)
}
 0xdcb   : > { %s2613_s15 = scalar_lea.hbm %s3094_s30, 128  ;;  %s2617_s18 = scalar_lea.hbm %s3142_s7, 256 }
 0xdcc   : > { %p2614_p6 = scmp.ne.s32.totalorder %s3094_s30, %s2613_s15  ;;  %p2618_p10 = scmp.lt.s32.totalorder %s3094_s30, %s3142_s7 }
 0xdcd   : > { %p2619_p11 = scmp.lt.s32.totalorder %s2617_s18, %s2613_s15 }
 0xdce   : > { %p2615_p7 = pnand %p2614_p6, %p2763_p4 }
 0xdcf   : > { %p2620_p12 = por %p2619_p11, %p2618_p10 }
 0xdd0   : > { %p2616_p9 = pneg %p2615_p7 }
 0xdd2   : > { %p2621_p13 = pnand %p2620_p12, %p2616_p9 }
 0xdd4   : > { %2624 = shalt.err (!%p2621_p13)
}
 0xdd5   : > { %2521 = dma.vmem_to_hbm [thread:$0]  (%p2763_p4), %s2055_s20, 128, %s3094_s30, %s2040_s8  }
 0xdd6 PF: > { %p2527_p0 = scmp.ge.s32.totalorder %s2675_s29, 2  ;;  %s2066_s22 = sand.u32 1, %s2655_s24  }
 0xdd7   : > { %s2067_s10 = scalar_lea.sflag [#allocation4], %s2066_s22 }
 0xdd8   : > { %p2524_p1 = pnand %p2527_p0, %p2770_p8 }
 0xdda   : > { %p2525_p2 = pneg %p2524_p1 }
 0xddc   : > { %2650 = dma.done.wait (%p2525_p2), %s2067_s10, 128  }
 0xddd   : > { %2652 = vsyncadd (%p2525_p2), %s2067_s10, 4294967168  ;;  %s20_s29 = sadd.s32 1, %s2675_s29   ;;  %s3145_s24 = smov %s2659_s25 }
 0xdde   : > { %p17_p3 = scmp.ge.s32.totalorder %s20_s29, 4   ;;  %s3146_s25 = smov %s2663_s26 }
 0xddf   : > { %s3147_s26 = smov %s2776_s14  ;;  %s3148_s27 = smov %s2671_s28 }
 0xde0   : > { %s3149_s28 = smov %s3151_s9  ;;  %19 = sbr.rel (!%p17_p3) target bundleno = 4 (0x4), region = 95 }
 0xde5   :  { %2072 = vsyncpa [#allocation4], 1 }
 0xde6   :  { %2074 = vsyncpa [#allocation4 + $0x1], 1 }

</bundles_post_ra>
